<compile_context>
chip_gen: v6e
topology: v6e:2x2x1
jax: 0.10.0
libtpu: 0.0.40
codegen_flags: <defaults>
</compile_context>

<pallas_src>
import jax
import jax.numpy as jnp
from jax.experimental import pallas as pl
from jax.experimental.pallas import tpu as pltpu


def _round_up(x, m):
    return ((x + m - 1) // m) * m


# ---------------------------------------------------------------------------
# in-kernel math helpers
# ---------------------------------------------------------------------------
def _layer_norm(x, w, b, eps=1e-5):
    # x: (N, D), w/b: (1, D)   (f32 throughout)
    mean = jnp.mean(x, axis=-1, keepdims=True)
    var = jnp.mean(jnp.square(x - mean), axis=-1, keepdims=True)
    return (x - mean) * jax.lax.rsqrt(var + eps) * w + b


def _gelu_tanh(x):
    # tanh-approximate GELU: pushes the transcendental onto the EUP slot.
    # TODO(synk): PyTorch nn.GELU() is the exact erf form; tanh approx differs
    # by <~1e-3 absolute — acceptable for this forward pass.
    c = 0.7978845608028654  # sqrt(2/pi)
    return 0.5 * x * (1.0 + jnp.tanh(c * (x + 0.044715 * x * x * x)))


# ---------------------------------------------------------------------------
# fused transformer layer kernel:  PreNorm2pm(Attention) + residual +
#                                  PreNorm(FeedForward)  + residual
# ---------------------------------------------------------------------------
def make_layer_kernel(heads, dim_head, n, n_pad):
    inner = heads * dim_head
    scale = dim_head ** (-0.5)
    eps = 1e-6
    bf16 = jnp.bfloat16
    f32 = jnp.float32

    def kernel(x_ref, pol_ref,
               a_lnw_ref, a_lnb_ref, wqkv_ref, wout_ref, bout_ref,
               f_lnw_ref, f_lnb_ref, w1_ref, b1_ref, w2_ref, b2_ref,
               out_ref, amap_ref):
        x = x_ref[0]                                          # (N, D) f32

        # ---------------- attention branch -------------------------------
        xn = _layer_norm(x, a_lnw_ref[...], a_lnb_ref[...])
        qkv = jnp.dot(xn.astype(bf16), wqkv_ref[...],
                      preferred_element_type=f32)             # (N, 3*inner)

        # scale folded into q once (N*dim_head mults, not N*N per head)
        q = (qkv[:, :inner] * scale).astype(bf16)
        k = qkv[:, inner:2 * inner].astype(bf16)
        v = qkv[:, 2 * inner:].astype(bf16)

        # Zero-pad K/V along the sequence axis so every score / attention-map
        # row is a lane-dense multiple of 128 (unmasked vst on the amap store).
        # Padded K rows are masked to -1e30 below; padded V rows are exactly 0
        # so they never contribute to the output.
        if n_pad > n:
            zseq = jnp.zeros((n_pad - n, inner), bf16)
            k = jnp.concatenate([k, zseq], axis=0)
            v = jnp.concatenate([v, zseq], axis=0)

        # reshape-based head split (no per-head slice / stack / concat)
        q4 = q.reshape(n, heads, dim_head)                    # (N,  H, dh)
        k4 = k.reshape(n_pad, heads, dim_head)                # (Np, H, dh)
        v4 = v.reshape(n_pad, heads, dim_head)                # (Np, H, dh)

        # QK^T for all heads at once (head axis batched on the MXU).
        # TODO(synk): when dim_head < 128, pack 2-4 heads per MXU pass
        # (block-diagonal K packing) — verify vmatmul vs relayout in the
        # bundle dump before investing.
        dots = jnp.einsum('qhd,khd->hqk', q4, k4,
                          preferred_element_type=f32)         # (H, N, Np)

        row = jax.lax.broadcasted_iota(jnp.int32, (n, n_pad), 0)
        col = jax.lax.broadcasted_iota(jnp.int32, (n, n_pad), 1)
        if n_pad > n:
            dots = jnp.where((col < n)[None], dots, -1e30)    # kill pad columns

        m0 = jnp.max(dots, axis=-1, keepdims=True)
        e0 = jnp.exp(dots - m0)                               # shared exp

        # plain softmax(dots0) -> returned attention map
        # (exact division + bf16, lane-dense store; pad columns are exactly 0)
        s0 = jnp.sum(e0, axis=-1, keepdims=True)
        amap_ref[0] = (e0 / s0).astype(amap_ref.dtype)

        # softmax_with_policy: e = e0 * policy off-diagonal, e0 on the diagonal
        # (no materialized eye / attn_policy temporaries).
        prow = pol_ref[0]                                     # (1, Np)
        diag = (row == col)
        e = jnp.where(diag[None], e0, e0 * prow)
        a = (e + eps / n) * pl.reciprocal(
            jnp.sum(e, axis=-1, keepdims=True) + eps, approx=True)

        # attn @ V for all heads at once; heads re-merged by reshape.
        o4 = jnp.einsum('hqk,khd->qhd', a.astype(bf16), v4,
                        preferred_element_type=f32)           # (N, H, dh)
        o = o4.reshape(n, inner)                              # (N, inner)

        attn_out = jnp.dot(o.astype(bf16), wout_ref[...],
                           preferred_element_type=f32) + bout_ref[...]
        ax = x + attn_out                                     # fused residual 1

        # ---------------- feed-forward branch ----------------------------
        xn2 = _layer_norm(ax, f_lnw_ref[...], f_lnb_ref[...])
        h = jnp.dot(xn2.astype(bf16), w1_ref[...],
                    preferred_element_type=f32) + b1_ref[...]
        h = jnp.maximum(h, 0.0)                               # ReLU
        ff = jnp.dot(h.astype(bf16), w2_ref[...],
                     preferred_element_type=f32) + b2_ref[...]
        out_ref[0] = ax + ff                                  # fused residual 2

    return kernel


# ---------------------------------------------------------------------------
# PredictorLG kernel (lane-dense 128-wide bf16 logits slab, sliced in wrapper)
# ---------------------------------------------------------------------------
def make_pred_kernel(n, dim, out_pad):
    half = dim // 2
    bf16 = jnp.bfloat16
    f32 = jnp.float32

    def kernel(x_ref, pol_ref, lnw_ref, lnb_ref, win_ref, bin_ref,
               w1_ref, b1_ref, w2_ref, b2_ref, w3_ref, b3_ref, out_ref):
        x = x_ref[0]                                           # (N, D)
        xn = _layer_norm(x, lnw_ref[...], lnb_ref[...])
        x1 = _gelu_tanh(jnp.dot(xn.astype(bf16), win_ref[...],
                                preferred_element_type=f32) + bin_ref[...])

        p = pol_ref[0]                                         # (N, 1)
        local_x = x1[:, :half]
        gsum = jnp.sum(x1[:, half:] * p, axis=0, keepdims=True)   # (1, half)
        psum = jnp.sum(p, axis=0, keepdims=True)                  # (1, 1)
        glob = gsum / psum                  # exact division (returned path)
        x2 = jnp.concatenate(
            [local_x, jnp.broadcast_to(glob, (n, half))], axis=-1)

        h1 = _gelu_tanh(jnp.dot(x2.astype(bf16), w1_ref[...],
                                preferred_element_type=f32) + b1_ref[...])
        h2 = _gelu_tanh(jnp.dot(h1.astype(bf16), w2_ref[...],
                                preferred_element_type=f32) + b2_ref[...])

        # w3/b3 are zero-padded to out_pad lanes -> lane-dense matmul & store;
        # the log-softmax is masked to the 2 real classes.
        logits = jnp.dot(h2.astype(bf16), w3_ref[...],
                         preferred_element_type=f32) + b3_ref[...]
        col = jax.lax.broadcasted_iota(jnp.int32, (n, out_pad), 1)
        masked = jnp.where(col < 2, logits, -1e30)
        m = jnp.max(masked, axis=-1, keepdims=True)
        lse = m + jnp.log(jnp.sum(jnp.exp(masked - m), axis=-1, keepdims=True))
        out_ref[0] = (logits - lse).astype(out_ref.dtype)      # cols 0..1 valid

    return kernel


# ---------------------------------------------------------------------------
# pallas_call wrappers
# ---------------------------------------------------------------------------
def _batch_spec(shape):
    nd = len(shape)
    return pl.BlockSpec(shape, lambda b, _nd=nd: (b,) + (0,) * (_nd - 1))


def _rep_spec(shape):
    # Replicated (weight) block: same block every grid step -> single-buffered.
    nd = len(shape)
    return pl.BlockSpec(shape, lambda b, _nd=nd: (0,) * _nd,
                        pipeline_mode=pl.Buffered(1))


def _compiler_params():
    # Per-generation VMEM budget: ~3/4 of physical per-core VMEM
    # (≈48 MiB on v7x's 64 MiB/TC, ≈96 MiB on v5e/v6e's 128 MiB).
    try:
        vmem_cap = int(pltpu.get_tpu_info().vmem_capacity_bytes)
    except Exception:
        vmem_cap = 64 * 1024 * 1024     # conservative fallback (v7x per-TC)
    limit = (vmem_cap * 3) // 4
    return pltpu.CompilerParams(
        dimension_semantics=("parallel",),
        vmem_limit_bytes=limit,
    )


_CPARAMS = _compiler_params()


def run_layer(x, policy_rows, lp, heads, dim_head, mlp_dim):
    """One fused transformer layer: x -> x + attn(LN(x)) -> (+ ff(LN(.)))."""
    B, N, D = x.shape
    inner = heads * dim_head
    n_pad = policy_rows.shape[-1]                  # lane-dense score width
    kernel = make_layer_kernel(heads, dim_head, N, n_pad)
    # TODO(synk): pad x/out feature dim to a multiple of 128 when D < 128
    # (demo-only artifact; real ViT dims are already 128-multiples).
    in_specs = [
        _batch_spec((1, N, D)),
        _batch_spec((1, 1, n_pad)),
        _rep_spec((1, D)), _rep_spec((1, D)),
        _rep_spec((D, 3 * inner)),
        _rep_spec((inner, D)), _rep_spec((1, D)),
        _rep_spec((1, D)), _rep_spec((1, D)),
        _rep_spec((D, mlp_dim)), _rep_spec((1, mlp_dim)),
        _rep_spec((mlp_dim, D)), _rep_spec((1, D)),
    ]
    out_specs = [_batch_spec((1, N, D)), _batch_spec((1, heads, N, n_pad))]
    out_shape = (jax.ShapeDtypeStruct((B, N, D), jnp.float32),
                 jax.ShapeDtypeStruct((B, heads, N, n_pad), jnp.bfloat16))
    out, amap = pl.pallas_call(
        kernel, grid=(B,), in_specs=in_specs, out_specs=out_specs,
        out_shape=out_shape, compiler_params=_CPARAMS,
    )(x, policy_rows, lp["attn_ln_w"], lp["attn_ln_b"],
      lp["wqkv"], lp["wout"], lp["bout"],
      lp["ff_ln_w"], lp["ff_ln_b"], lp["w1"], lp["b1"], lp["w2"], lp["b2"])
    # TODO(synk): for N >~ 700 add a q-block / flash-style KV grid axis to
    # bound (H, N, N) temporaries and give megacore more steps; fp8 weights
    # (+ per-channel scales) would further help v7x.
    if n_pad > N:
        amap = amap[:, :, :, :N]                   # real (B, heads, N, N)
    return out, amap


def run_predictor(x, policy, pp):
    B, N, D = x.shape
    half, quarter = D // 2, D // 4
    PAD = 128
    kernel = make_pred_kernel(N, D, PAD)
    in_specs = [
        _batch_spec((1, N, D)),
        _batch_spec((1, N, 1)),
        _rep_spec((1, D)), _rep_spec((1, D)),
        _rep_spec((D, D)), _rep_spec((1, D)),
        _rep_spec((D, half)), _rep_spec((1, half)),
        _rep_spec((half, quarter)), _rep_spec((1, quarter)),
        _rep_spec((quarter, PAD)), _rep_spec((1, PAD)),
    ]
    out = pl.pallas_call(
        kernel, grid=(B,), in_specs=in_specs,
        out_specs=_batch_spec((1, N, PAD)),
        out_shape=jax.ShapeDtypeStruct((B, N, PAD), jnp.bfloat16),
        compiler_params=_CPARAMS,
    )(x, policy, pp["ln_w"], pp["ln_b"], pp["win"], pp["bin"],
      pp["w1"], pp["b1"], pp["w2"], pp["b2"], pp["w3p"], pp["b3p"])
    return out[:, :, :2].astype(jnp.float32)       # real 2 classes, f32 logits


# ---------------------------------------------------------------------------
# glue: parameter init, gumbel softmax, full forward
# ---------------------------------------------------------------------------
def init_params(key, dim, depth, heads, dim_head, mlp_dim):
    inner = heads * dim_head
    wdt = jnp.bfloat16   # matmul weights in bf16; accumulation stays f32

    def lin(k, din, dout):
        return (jax.random.normal(k, (din, dout), jnp.float32) * 0.02).astype(wdt)

    keys = iter(jax.random.split(key, depth * 4 + 8))
    layers = []
    for _ in range(depth):
        layers.append(dict(
            attn_ln_w=jnp.ones((1, dim), jnp.float32),
            attn_ln_b=jnp.zeros((1, dim), jnp.float32),
            wqkv=lin(next(keys), dim, 3 * inner),
            wout=lin(next(keys), inner, dim),
            bout=jnp.zeros((1, dim), jnp.float32),
            ff_ln_w=jnp.ones((1, dim), jnp.float32),
            ff_ln_b=jnp.zeros((1, dim), jnp.float32),
            w1=lin(next(keys), dim, mlp_dim),
            b1=jnp.zeros((1, mlp_dim), jnp.float32),
            w2=lin(next(keys), mlp_dim, dim),
            b2=jnp.zeros((1, dim), jnp.float32),
        ))
    # predictor: final Linear(dim//4, 2) is zero-padded to 128 output lanes so
    # the kernel's last matmul / store are lane-dense.
    w3 = jax.random.normal(next(keys), (dim // 4, 2), jnp.float32) * 0.02
    w3p = jnp.zeros((dim // 4, 128), jnp.float32).at[:, :2].set(w3).astype(wdt)
    pred = dict(
        ln_w=jnp.ones((1, dim), jnp.float32),
        ln_b=jnp.zeros((1, dim), jnp.float32),
        win=lin(next(keys), dim, dim),
        bin=jnp.zeros((1, dim), jnp.float32),
        w1=lin(next(keys), dim, dim // 2),
        b1=jnp.zeros((1, dim // 2), jnp.float32),
        w2=lin(next(keys), dim // 2, dim // 4),
        b2=jnp.zeros((1, dim // 4), jnp.float32),
        w3p=w3p,
        b3p=jnp.zeros((1, 128), jnp.float32),
    )
    return dict(layers=layers, pred=pred)


def gumbel_softmax_hard(logits, key, tau=1.0):
    # forward value of F.gumbel_softmax(..., hard=True): one-hot of argmax of
    # the gumbel-perturbed logits (straight-through grad not needed here).
    u = jax.random.uniform(key, logits.shape, minval=1e-9, maxval=1.0)
    g = -jnp.log(-jnp.log(u))
    y = (logits + g) / tau
    idx = jnp.argmax(y, axis=-1)
    return jax.nn.one_hot(idx, logits.shape[-1], dtype=logits.dtype)


def _policy_to_rows(policy, n_pad):
    # (B, N, 1) -> (B, 1, N_pad): transpose + zero-pad once per policy update
    # (hoisted out of the per-layer loop).
    B, N, _ = policy.shape
    pt = jnp.transpose(policy, (0, 2, 1))
    if n_pad > N:
        pt = jnp.pad(pt, ((0, 0), (0, 0), (0, n_pad - N)))
    return pt


def transformer_dvit_forward(x, params, key, heads, dim_head, mlp_dim):
    # NOTE: the reference module's `rpe` branch builds relative-position
    # tables but never applies them (dots = dots0), so it is omitted here.
    B, N, _ = x.shape
    n_pad = _round_up(N, 128)
    prev_decision = jnp.ones((B, N, 1), x.dtype)
    policy_rows = _policy_to_rows(jnp.ones((B, N, 1), x.dtype), n_pad)
    attns = []
    for index, lp in enumerate(params["layers"]):
        if index == 1:
            pred_score = run_predictor(x, prev_decision, params["pred"])
            hard = gumbel_softmax_hard(pred_score, key)
            policy = hard[:, :, 0:1] * prev_decision
            policy_rows = _policy_to_rows(policy, n_pad)
            prev_decision = pred_score      # matches reference (kept as-is)
        x, attnmap = run_layer(x, policy_rows, lp, heads, dim_head, mlp_dim)
        attns.append(attnmap)
    return x, attns


if __name__ == "__main__":
    B, N, D = 2, 8, 32
    heads, dim_head, mlp_dim, depth = 4, 8, 64, 3

    root = jax.random.PRNGKey(0)
    kx, kp, kg = jax.random.split(root, 3)
    x = jax.random.normal(kx, (B, N, D), jnp.float32)
    params = init_params(kp, D, depth, heads, dim_head, mlp_dim)

    out, attns = transformer_dvit_forward(x, params, kg, heads, dim_head, mlp_dim)
    jax.block_until_ready(out)
    for a in attns:
        jax.block_until_ready(a)

    assert out.shape == (B, N, D)
    assert all(a.shape == (B, heads, N, N) for a in attns)
    assert bool(jnp.all(jnp.isfinite(out)))
    print("KERNEL_OK")
</pallas_src>

<mosaic_0001>
module attributes {stable_mosaic.version = 11 : i64} {
  func.func @kernel(%arg0: i32, %arg1: memref<1x8x32xf32, #tpu.memory_space<vmem>>, %arg2: memref<1x1x128xf32, #tpu.memory_space<vmem>>, %arg3: memref<1x32xf32, #tpu.memory_space<vmem>>, %arg4: memref<1x32xf32, #tpu.memory_space<vmem>>, %arg5: memref<32x96xbf16, #tpu.memory_space<vmem>>, %arg6: memref<32x32xbf16, #tpu.memory_space<vmem>>, %arg7: memref<1x32xf32, #tpu.memory_space<vmem>>, %arg8: memref<1x32xf32, #tpu.memory_space<vmem>>, %arg9: memref<1x32xf32, #tpu.memory_space<vmem>>, %arg10: memref<32x64xbf16, #tpu.memory_space<vmem>>, %arg11: memref<1x64xf32, #tpu.memory_space<vmem>>, %arg12: memref<64x32xbf16, #tpu.memory_space<vmem>>, %arg13: memref<1x32xf32, #tpu.memory_space<vmem>>, %arg14: memref<1x8x32xf32, #tpu.memory_space<vmem>>, %arg15: memref<1x4x8x128xbf16, #tpu.memory_space<vmem>>) attributes {dimension_semantics = [#tpu.dimension_semantics<parallel>], iteration_bounds = array<i64: 2>, scalar_prefetch = 0 : i64, scratch_operands = 0 : i64, tpu.core_type = #tpu.core_type<tc>, window_params = [{transform_indices = @transform_0, window_bounds = array<i64: 1, 8, 32>}, {transform_indices = @transform_1, window_bounds = array<i64: 1, 1, 128>}, {pipeline_mode = #tpu.pipeline_mode<synchronous>, transform_indices = @transform_2, window_bounds = array<i64: 1, 32>}, {pipeline_mode = #tpu.pipeline_mode<synchronous>, transform_indices = @transform_3, window_bounds = array<i64: 1, 32>}, {pipeline_mode = #tpu.pipeline_mode<synchronous>, transform_indices = @transform_4, window_bounds = array<i64: 32, 96>}, {pipeline_mode = #tpu.pipeline_mode<synchronous>, transform_indices = @transform_5, window_bounds = array<i64: 32, 32>}, {pipeline_mode = #tpu.pipeline_mode<synchronous>, transform_indices = @transform_6, window_bounds = array<i64: 1, 32>}, {pipeline_mode = #tpu.pipeline_mode<synchronous>, transform_indices = @transform_7, window_bounds = array<i64: 1, 32>}, {pipeline_mode = #tpu.pipeline_mode<synchronous>, transform_indices = @transform_8, window_bounds = array<i64: 1, 32>}, {pipeline_mode = #tpu.pipeline_mode<synchronous>, transform_indices = @transform_9, window_bounds = array<i64: 32, 64>}, {pipeline_mode = #tpu.pipeline_mode<synchronous>, transform_indices = @transform_10, window_bounds = array<i64: 1, 64>}, {pipeline_mode = #tpu.pipeline_mode<synchronous>, transform_indices = @transform_11, window_bounds = array<i64: 64, 32>}, {pipeline_mode = #tpu.pipeline_mode<synchronous>, transform_indices = @transform_12, window_bounds = array<i64: 1, 32>}, {transform_indices = @transform_13, window_bounds = array<i64: 1, 8, 32>}, {transform_indices = @transform_14, window_bounds = array<i64: 1, 4, 8, 128>}]} {
    %c0 = arith.constant 0 : index
    %c0_0 = arith.constant 0 : index
    %c0_1 = arith.constant 0 : index
    %0 = vector.load %arg1[%c0, %c0_0, %c0_1] : memref<1x8x32xf32, #tpu.memory_space<vmem>>, vector<1x8x32xf32>
    %1 = vector.shape_cast %0 : vector<1x8x32xf32> to vector<8x32xf32>
    %c0_2 = arith.constant 0 : index
    %c0_3 = arith.constant 0 : index
    %2 = vector.load %arg3[%c0_2, %c0_3] : memref<1x32xf32, #tpu.memory_space<vmem>>, vector<1x32xf32>
    %c0_4 = arith.constant 0 : index
    %c0_5 = arith.constant 0 : index
    %3 = vector.load %arg4[%c0_4, %c0_5] : memref<1x32xf32, #tpu.memory_space<vmem>>, vector<1x32xf32>
    %cst = arith.constant dense<0.000000e+00> : vector<8xf32>
    %4 = vector.multi_reduction <add>, %1, %cst [1] : vector<8x32xf32> to vector<8xf32>
    %5 = vector.shape_cast %4 : vector<8xf32> to vector<8x1xf32>
    %cst_6 = arith.constant 3.200000e+01 : f32
    %6 = vector.broadcast %cst_6 : f32 to vector<8x1xf32>
    %7 = arith.divf %5, %6 : vector<8x1xf32>
    %8 = vector.broadcast %7 : vector<8x1xf32> to vector<8x32xf32>
    %9 = arith.subf %1, %8 : vector<8x32xf32>
    %10 = arith.mulf %9, %9 : vector<8x32xf32>
    %cst_7 = arith.constant dense<0.000000e+00> : vector<8xf32>
    %11 = vector.multi_reduction <add>, %10, %cst_7 [1] : vector<8x32xf32> to vector<8xf32>
    %12 = vector.shape_cast %11 : vector<8xf32> to vector<8x1xf32>
    %cst_8 = arith.constant 3.200000e+01 : f32
    %13 = vector.broadcast %cst_8 : f32 to vector<8x1xf32>
    %14 = arith.divf %12, %13 : vector<8x1xf32>
    %15 = vector.broadcast %7 : vector<8x1xf32> to vector<8x32xf32>
    %16 = arith.subf %1, %15 : vector<8x32xf32>
    %cst_9 = arith.constant 9.99999974E-6 : f32
    %17 = vector.broadcast %cst_9 : f32 to vector<8x1xf32>
    %18 = arith.addf %14, %17 : vector<8x1xf32>
    %19 = math.rsqrt %18 : vector<8x1xf32>
    %20 = vector.broadcast %19 : vector<8x1xf32> to vector<8x32xf32>
    %21 = arith.mulf %16, %20 : vector<8x32xf32>
    %22 = vector.broadcast %2 : vector<1x32xf32> to vector<8x32xf32>
    %23 = arith.mulf %21, %22 : vector<8x32xf32>
    %24 = vector.broadcast %3 : vector<1x32xf32> to vector<8x32xf32>
    %25 = arith.addf %23, %24 : vector<8x32xf32>
    %26 = arith.truncf %25 : vector<8x32xf32> to vector<8x32xbf16>
    %c0_10 = arith.constant 0 : index
    %c0_11 = arith.constant 0 : index
    %27 = vector.load %arg5[%c0_10, %c0_11] : memref<32x96xbf16, #tpu.memory_space<vmem>>, vector<32x96xbf16>
    %cst_12 = arith.constant dense<0.000000e+00> : vector<8x96xf32>
    %28 = tpu.matmul %26, %27, %cst_12 {dimension_numbers = #tpu.dot_dimension_numbers<[1], [0], [0], [1], [0, 0, 1, 1], [], []>} : vector<8x32xbf16>, vector<32x96xbf16>, vector<8x96xf32> -> vector<8x96xf32>
    %29 = vector.extract_strided_slice %28 {offsets = [0, 0], sizes = [8, 32], strides = [1, 1]} : vector<8x96xf32> to vector<8x32xf32>
    %cst_13 = arith.constant 0.353553385 : f32
    %30 = vector.broadcast %cst_13 : f32 to vector<8x32xf32>
    %31 = arith.mulf %29, %30 : vector<8x32xf32>
    %32 = arith.truncf %31 : vector<8x32xf32> to vector<8x32xbf16>
    %33 = vector.extract_strided_slice %28 {offsets = [0, 32], sizes = [8, 32], strides = [1, 1]} : vector<8x96xf32> to vector<8x32xf32>
    %34 = arith.truncf %33 : vector<8x32xf32> to vector<8x32xbf16>
    %35 = vector.extract_strided_slice %28 {offsets = [0, 64], sizes = [8, 32], strides = [1, 1]} : vector<8x96xf32> to vector<8x32xf32>
    %36 = arith.truncf %35 : vector<8x32xf32> to vector<8x32xbf16>
    %cst_14 = arith.constant 0.000000e+00 : bf16
    %37 = vector.broadcast %cst_14 : bf16 to vector<120x32xbf16>
    %38 = tpu.concatenate %34, %37 in 0 : vector<8x32xbf16>, vector<120x32xbf16> -> vector<128x32xbf16>
    %39 = tpu.concatenate %36, %37 in 0 : vector<8x32xbf16>, vector<120x32xbf16> -> vector<128x32xbf16>
    %40 = vector.shape_cast %32 : vector<8x32xbf16> to vector<8x4x8xbf16>
    %41 = vector.shape_cast %38 : vector<128x32xbf16> to vector<128x4x8xbf16>
    %42 = vector.shape_cast %39 : vector<128x32xbf16> to vector<128x4x8xbf16>
    "tpu.trace_start"() <{level = 10 : i32, message = "qhd,khd->hqk"}> : () -> ()
    %cst_15 = arith.constant dense<0.000000e+00> : vector<4x8x128xf32>
    %43 = tpu.matmul %40, %41, %cst_15 {dimension_numbers = #tpu.dot_dimension_numbers<[2], [2], [0], [0], [0, 1, 0, 0, 1, 0], [1], [1]>} : vector<8x4x8xbf16>, vector<128x4x8xbf16>, vector<4x8x128xf32> -> vector<4x8x128xf32>
    "tpu.trace_stop"() : () -> ()
    %44 = tpu.iota {dimensions = array<i32: 0>} : vector<8x128xi32>
    %45 = tpu.iota {dimensions = array<i32: 1>} : vector<8x128xi32>
    %c8_i32 = arith.constant 8 : i32
    %46 = vector.broadcast %c8_i32 : i32 to vector<8x128xi32>
    %47 = arith.cmpi slt, %45, %46 : vector<8x128xi32>
    %48 = vector.shape_cast %47 : vector<8x128xi1> to vector<1x8x128xi1>
    %cst_16 = arith.constant -1.000000e+30 : f32
    %49 = vector.shape_cast %48 : vector<1x8x128xi1> to vector<1x8x128xi1>
    %50 = vector.broadcast %49 : vector<1x8x128xi1> to vector<4x8x128xi1>
    %51 = vector.broadcast %cst_16 : f32 to vector<4x8x128xf32>
    %52 = arith.select %50, %43, %51 : vector<4x8x128xi1>, vector<4x8x128xf32>
    %cst_17 = arith.constant dense<0xFF800000> : vector<4x8xf32>
    %53 = vector.multi_reduction <maximumf>, %52, %cst_17 [2] : vector<4x8x128xf32> to vector<4x8xf32>
    %54 = vector.shape_cast %53 : vector<4x8xf32> to vector<4x8x1xf32>
    %55 = vector.broadcast %54 : vector<4x8x1xf32> to vector<4x8x128xf32>
    %56 = arith.subf %52, %55 : vector<4x8x128xf32>
    %57 = math.exp %56 : vector<4x8x128xf32>
    %cst_18 = arith.constant dense<0.000000e+00> : vector<4x8xf32>
    %58 = vector.multi_reduction <add>, %57, %cst_18 [2] : vector<4x8x128xf32> to vector<4x8xf32>
    %59 = vector.shape_cast %58 : vector<4x8xf32> to vector<4x8x1xf32>
    %60 = vector.broadcast %59 : vector<4x8x1xf32> to vector<4x8x128xf32>
    %61 = arith.divf %57, %60 : vector<4x8x128xf32>
    %62 = arith.truncf %61 : vector<4x8x128xf32> to vector<4x8x128xbf16>
    %c0_19 = arith.constant 0 : index
    %c0_20 = arith.constant 0 : index
    %c0_21 = arith.constant 0 : index
    %c0_22 = arith.constant 0 : index
    %63 = vector.load %arg15[%c0_19, %c0_20, %c0_21, %c0_22] : memref<1x4x8x128xbf16, #tpu.memory_space<vmem>>, vector<1x4x8x128xbf16>
    %64 = vector.shape_cast %63 : vector<1x4x8x128xbf16> to vector<4x8x128xbf16>
    %65 = vector.shape_cast %62 : vector<4x8x128xbf16> to vector<1x4x8x128xbf16>
    tpu.vector_store %arg15[%c0_19, %c0_20, %c0_21, %c0_22], %65 {strides = array<i32>} : memref<1x4x8x128xbf16, #tpu.memory_space<vmem>>, vector<1x4x8x128xbf16>,
    %c0_23 = arith.constant 0 : index
    %c0_24 = arith.constant 0 : index
    %c0_25 = arith.constant 0 : index
    %66 = vector.load %arg2[%c0_23, %c0_24, %c0_25] : memref<1x1x128xf32, #tpu.memory_space<vmem>>, vector<1x1x128xf32>
    %67 = vector.shape_cast %66 : vector<1x1x128xf32> to vector<1x128xf32>
    %68 = arith.cmpi eq, %44, %45 : vector<8x128xi32>
    %69 = vector.shape_cast %68 : vector<8x128xi1> to vector<1x8x128xi1>
    %70 = vector.shape_cast %67 : vector<1x128xf32> to vector<1x1x128xf32>
    %71 = vector.broadcast %70 : vector<1x1x128xf32> to vector<4x8x128xf32>
    %72 = arith.mulf %57, %71 : vector<4x8x128xf32>
    %73 = vector.shape_cast %69 : vector<1x8x128xi1> to vector<1x8x128xi1>
    %74 = vector.broadcast %73 : vector<1x8x128xi1> to vector<4x8x128xi1>
    %75 = arith.select %74, %57, %72 : vector<4x8x128xi1>, vector<4x8x128xf32>
    %cst_26 = arith.constant 1.250000e-07 : f32
    %76 = vector.broadcast %cst_26 : f32 to vector<4x8x128xf32>
    %77 = arith.addf %75, %76 : vector<4x8x128xf32>
    %cst_27 = arith.constant dense<0.000000e+00> : vector<4x8xf32>
    %78 = vector.multi_reduction <add>, %75, %cst_27 [2] : vector<4x8x128xf32> to vector<4x8xf32>
    %79 = vector.shape_cast %78 : vector<4x8xf32> to vector<4x8x1xf32>
    %cst_28 = arith.constant 9.99999997E-7 : f32
    %80 = vector.broadcast %cst_28 : f32 to vector<4x8x1xf32>
    %81 = arith.addf %79, %80 : vector<4x8x1xf32>
    %82 = tpu.reciprocal %81 {approx = true} : vector<4x8x1xf32> -> vector<4x8x1xf32>
    %83 = vector.broadcast %82 : vector<4x8x1xf32> to vector<4x8x128xf32>
    %84 = arith.mulf %77, %83 : vector<4x8x128xf32>
    %85 = arith.truncf %84 : vector<4x8x128xf32> to vector<4x8x128xbf16>
    "tpu.trace_start"() <{level = 10 : i32, message = "hqk,khd->qhd"}> : () -> ()
    %cst_29 = arith.constant dense<0.000000e+00> : vector<4x8x8xf32>
    %86 = tpu.matmul %42, %85, %cst_29 {dimension_numbers = #tpu.dot_dimension_numbers<[0], [2], [2], [1], [0, 1, 0, 2, 1, 1], [1], [0]>} : vector<128x4x8xbf16>, vector<4x8x128xbf16>, vector<4x8x8xf32> -> vector<4x8x8xf32>
    %87 = tpu.transpose %86, [2, 0, 1] : vector<4x8x8xf32> -> vector<8x4x8xf32>
    "tpu.trace_stop"() : () -> ()
    %88 = vector.shape_cast %87 : vector<8x4x8xf32> to vector<8x32xf32>
    %89 = arith.truncf %88 : vector<8x32xf32> to vector<8x32xbf16>
    %c0_30 = arith.constant 0 : index
    %c0_31 = arith.constant 0 : index
    %90 = vector.load %arg6[%c0_30, %c0_31] : memref<32x32xbf16, #tpu.memory_space<vmem>>, vector<32x32xbf16>
    %cst_32 = arith.constant dense<0.000000e+00> : vector<8x32xf32>
    %91 = tpu.matmul %89, %90, %cst_32 {dimension_numbers = #tpu.dot_dimension_numbers<[1], [0], [0], [1], [0, 0, 1, 1], [], []>} : vector<8x32xbf16>, vector<32x32xbf16>, vector<8x32xf32> -> vector<8x32xf32>
    %c0_33 = arith.constant 0 : index
    %c0_34 = arith.constant 0 : index
    %92 = vector.load %arg7[%c0_33, %c0_34] : memref<1x32xf32, #tpu.memory_space<vmem>>, vector<1x32xf32>
    %93 = vector.broadcast %92 : vector<1x32xf32> to vector<8x32xf32>
    %94 = arith.addf %91, %93 : vector<8x32xf32>
    %95 = arith.addf %1, %94 : vector<8x32xf32>
    %c0_35 = arith.constant 0 : index
    %c0_36 = arith.constant 0 : index
    %96 = vector.load %arg8[%c0_35, %c0_36] : memref<1x32xf32, #tpu.memory_space<vmem>>, vector<1x32xf32>
    %c0_37 = arith.constant 0 : index
    %c0_38 = arith.constant 0 : index
    %97 = vector.load %arg9[%c0_37, %c0_38] : memref<1x32xf32, #tpu.memory_space<vmem>>, vector<1x32xf32>
    %cst_39 = arith.constant dense<0.000000e+00> : vector<8xf32>
    %98 = vector.multi_reduction <add>, %95, %cst_39 [1] : vector<8x32xf32> to vector<8xf32>
    %99 = vector.shape_cast %98 : vector<8xf32> to vector<8x1xf32>
    %cst_40 = arith.constant 3.200000e+01 : f32
    %100 = vector.broadcast %cst_40 : f32 to vector<8x1xf32>
    %101 = arith.divf %99, %100 : vector<8x1xf32>
    %102 = vector.broadcast %101 : vector<8x1xf32> to vector<8x32xf32>
    %103 = arith.subf %95, %102 : vector<8x32xf32>
    %104 = arith.mulf %103, %103 : vector<8x32xf32>
    %cst_41 = arith.constant dense<0.000000e+00> : vector<8xf32>
    %105 = vector.multi_reduction <add>, %104, %cst_41 [1] : vector<8x32xf32> to vector<8xf32>
    %106 = vector.shape_cast %105 : vector<8xf32> to vector<8x1xf32>
    %cst_42 = arith.constant 3.200000e+01 : f32
    %107 = vector.broadcast %cst_42 : f32 to vector<8x1xf32>
    %108 = arith.divf %106, %107 : vector<8x1xf32>
    %109 = vector.broadcast %101 : vector<8x1xf32> to vector<8x32xf32>
    %110 = arith.subf %95, %109 : vector<8x32xf32>
    %cst_43 = arith.constant 9.99999974E-6 : f32
    %111 = vector.broadcast %cst_43 : f32 to vector<8x1xf32>
    %112 = arith.addf %108, %111 : vector<8x1xf32>
    %113 = math.rsqrt %112 : vector<8x1xf32>
    %114 = vector.broadcast %113 : vector<8x1xf32> to vector<8x32xf32>
    %115 = arith.mulf %110, %114 : vector<8x32xf32>
    %116 = vector.broadcast %96 : vector<1x32xf32> to vector<8x32xf32>
    %117 = arith.mulf %115, %116 : vector<8x32xf32>
    %118 = vector.broadcast %97 : vector<1x32xf32> to vector<8x32xf32>
    %119 = arith.addf %117, %118 : vector<8x32xf32>
    %120 = arith.truncf %119 : vector<8x32xf32> to vector<8x32xbf16>
    %c0_44 = arith.constant 0 : index
    %c0_45 = arith.constant 0 : index
    %121 = vector.load %arg10[%c0_44, %c0_45] : memref<32x64xbf16, #tpu.memory_space<vmem>>, vector<32x64xbf16>
    %cst_46 = arith.constant dense<0.000000e+00> : vector<8x64xf32>
    %122 = tpu.matmul %120, %121, %cst_46 {dimension_numbers = #tpu.dot_dimension_numbers<[1], [0], [0], [1], [0, 0, 1, 1], [], []>} : vector<8x32xbf16>, vector<32x64xbf16>, vector<8x64xf32> -> vector<8x64xf32>
    %c0_47 = arith.constant 0 : index
    %c0_48 = arith.constant 0 : index
    %123 = vector.load %arg11[%c0_47, %c0_48] : memref<1x64xf32, #tpu.memory_space<vmem>>, vector<1x64xf32>
    %124 = vector.broadcast %123 : vector<1x64xf32> to vector<8x64xf32>
    %125 = arith.addf %122, %124 : vector<8x64xf32>
    %cst_49 = arith.constant 0.000000e+00 : f32
    %126 = vector.broadcast %cst_49 : f32 to vector<8x64xf32>
    %127 = arith.maximumf %125, %126 : vector<8x64xf32>
    %128 = arith.truncf %127 : vector<8x64xf32> to vector<8x64xbf16>
    %c0_50 = arith.constant 0 : index
    %c0_51 = arith.constant 0 : index
    %129 = vector.load %arg12[%c0_50, %c0_51] : memref<64x32xbf16, #tpu.memory_space<vmem>>, vector<64x32xbf16>
    %cst_52 = arith.constant dense<0.000000e+00> : vector<8x32xf32>
    %130 = tpu.matmul %128, %129, %cst_52 {dimension_numbers = #tpu.dot_dimension_numbers<[1], [0], [0], [1], [0, 0, 1, 1], [], []>} : vector<8x64xbf16>, vector<64x32xbf16>, vector<8x32xf32> -> vector<8x32xf32>
    %c0_53 = arith.constant 0 : index
    %c0_54 = arith.constant 0 : index
    %131 = vector.load %arg13[%c0_53, %c0_54] : memref<1x32xf32, #tpu.memory_space<vmem>>, vector<1x32xf32>
    %132 = vector.broadcast %131 : vector<1x32xf32> to vector<8x32xf32>
    %133 = arith.addf %130, %132 : vector<8x32xf32>
    %134 = arith.addf %95, %133 : vector<8x32xf32>
    %c0_55 = arith.constant 0 : index
    %c0_56 = arith.constant 0 : index
    %c0_57 = arith.constant 0 : index
    %135 = vector.load %arg14[%c0_55, %c0_56, %c0_57] : memref<1x8x32xf32, #tpu.memory_space<vmem>>, vector<1x8x32xf32>
    %136 = vector.shape_cast %135 : vector<1x8x32xf32> to vector<8x32xf32>
    %137 = vector.shape_cast %134 : vector<8x32xf32> to vector<1x8x32xf32>
    tpu.vector_store %arg14[%c0_55, %c0_56, %c0_57], %137 {strides = array<i32>} : memref<1x8x32xf32, #tpu.memory_space<vmem>>, vector<1x8x32xf32>,
    return
  }
  func.func @transform_0(%arg0: i32) -> (i32, i32, i32) {
    %c0_i32 = arith.constant 0 : i32
    %c0_i32_0 = arith.constant 0 : i32
    %c0_i32_1 = arith.constant 0 : i32
    return %arg0, %c0_i32, %c0_i32_0 : i32, i32, i32
  }
  func.func @transform_1(%arg0: i32) -> (i32, i32, i32) {
    %c0_i32 = arith.constant 0 : i32
    %c0_i32_0 = arith.constant 0 : i32
    %c0_i32_1 = arith.constant 0 : i32
    return %arg0, %c0_i32, %c0_i32_0 : i32, i32, i32
  }
  func.func @transform_2(%arg0: i32) -> (i32, i32) {
    %c0_i32 = arith.constant 0 : i32
    %c0_i32_0 = arith.constant 0 : i32
    %c0_i32_1 = arith.constant 0 : i32
    return %c0_i32, %c0_i32_0 : i32, i32
  }
  func.func @transform_3(%arg0: i32) -> (i32, i32) {
    %c0_i32 = arith.constant 0 : i32
    %c0_i32_0 = arith.constant 0 : i32
    %c0_i32_1 = arith.constant 0 : i32
    return %c0_i32, %c0_i32_0 : i32, i32
  }
  func.func @transform_4(%arg0: i32) -> (i32, i32) {
    %c0_i32 = arith.constant 0 : i32
    %c0_i32_0 = arith.constant 0 : i32
    %c0_i32_1 = arith.constant 0 : i32
    return %c0_i32, %c0_i32_0 : i32, i32
  }
  func.func @transform_5(%arg0: i32) -> (i32, i32) {
    %c0_i32 = arith.constant 0 : i32
    %c0_i32_0 = arith.constant 0 : i32
    %c0_i32_1 = arith.constant 0 : i32
    return %c0_i32, %c0_i32_0 : i32, i32
  }
  func.func @transform_6(%arg0: i32) -> (i32, i32) {
    %c0_i32 = arith.constant 0 : i32
    %c0_i32_0 = arith.constant 0 : i32
    %c0_i32_1 = arith.constant 0 : i32
    return %c0_i32, %c0_i32_0 : i32, i32
  }
  func.func @transform_7(%arg0: i32) -> (i32, i32) {
    %c0_i32 = arith.constant 0 : i32
    %c0_i32_0 = arith.constant 0 : i32
    %c0_i32_1 = arith.constant 0 : i32
    return %c0_i32, %c0_i32_0 : i32, i32
  }
  func.func @transform_8(%arg0: i32) -> (i32, i32) {
    %c0_i32 = arith.constant 0 : i32
    %c0_i32_0 = arith.constant 0 : i32
    %c0_i32_1 = arith.constant 0 : i32
    return %c0_i32, %c0_i32_0 : i32, i32
  }
  func.func @transform_9(%arg0: i32) -> (i32, i32) {
    %c0_i32 = arith.constant 0 : i32
    %c0_i32_0 = arith.constant 0 : i32
    %c0_i32_1 = arith.constant 0 : i32
    return %c0_i32, %c0_i32_0 : i32, i32
  }
  func.func @transform_10(%arg0: i32) -> (i32, i32) {
    %c0_i32 = arith.constant 0 : i32
    %c0_i32_0 = arith.constant 0 : i32
    %c0_i32_1 = arith.constant 0 : i32
    return %c0_i32, %c0_i32_0 : i32, i32
  }
  func.func @transform_11(%arg0: i32) -> (i32, i32) {
    %c0_i32 = arith.constant 0 : i32
    %c0_i32_0 = arith.constant 0 : i32
    %c0_i32_1 = arith.constant 0 : i32
    return %c0_i32, %c0_i32_0 : i32, i32
  }
  func.func @transform_12(%arg0: i32) -> (i32, i32) {
    %c0_i32 = arith.constant 0 : i32
    %c0_i32_0 = arith.constant 0 : i32
    %c0_i32_1 = arith.constant 0 : i32
    return %c0_i32, %c0_i32_0 : i32, i32
  }
  func.func @transform_13(%arg0: i32) -> (i32, i32, i32) {
    %c0_i32 = arith.constant 0 : i32
    %c0_i32_0 = arith.constant 0 : i32
    %c0_i32_1 = arith.constant 0 : i32
    return %arg0, %c0_i32, %c0_i32_0 : i32, i32, i32
  }
  func.func @transform_14(%arg0: i32) -> (i32, i32, i32, i32) {
    %c0_i32 = arith.constant 0 : i32
    %c0_i32_0 = arith.constant 0 : i32
    %c0_i32_1 = arith.constant 0 : i32
    %c0_i32_2 = arith.constant 0 : i32
    return %arg0, %c0_i32, %c0_i32_0, %c0_i32_1 : i32, i32, i32, i32
  }
}

</mosaic_0001>

<bundles_post_ra>
// kernel: tpu_custom_call.1
= control target key start
LH: loop header
LB: loop body
LE: loop exit
PB: predicated region body
PF: predicated region fallthrough
CT: control target
= control target key end

     0   :  { %s3218_s0 = inlined_call_operand.vmem [shape: f32[2,8,32], index: 0, kind: input, shape index: {}]   ;;  %s3219_s1 = inlined_call_operand.hbm [shape: f32[2,1,128], index: 1, kind: input, shape index: {}]   ;;  %s3220_s2 = inlined_call_operand.hbm [shape: f32[1,32], index: 2, kind: input, shape index: {}]   ;;  %s3221_s3 = inlined_call_operand.hbm [shape: f32[1,32], index: 3, kind: input, shape index: {}]   ;;  %s3222_s4 = inlined_call_operand.vmem [shape: bf16[32,96], index: 4, kind: input, shape index: {}]   ;;  %s3223_s5 = inlined_call_operand.vmem [shape: bf16[32,32], index: 5, kind: input, shape index: {}]   ;;  %s3224_s6 = inlined_call_operand.hbm [shape: f32[1,32], index: 6, kind: input, shape index: {}]   ;;  %s3225_s7 = inlined_call_operand.hbm [shape: f32[1,32], index: 7, kind: input, shape index: {}]   ;;  %s3226_s8 = inlined_call_operand.hbm [shape: f32[1,32], index: 8, kind: input, shape index: {}]   ;;  %s3227_s9 = inlined_call_operand.vmem [shape: bf16[32,64], index: 9, kind: input, shape index: {}]   ;;  %s3228_s10 = inlined_call_operand.vmem [shape: f32[1,64], index: 10, kind: input, shape index: {}]   ;;  %s3229_s11 = inlined_call_operand.vmem [shape: bf16[64,32], index: 11, kind: input, shape index: {}]   ;;  %s3230_s12 = inlined_call_operand.vmem [shape: f32[1,32], index: 12, kind: input, shape index: {}]   ;;  %s3231_s13 = inlined_call_operand.hbm [shape: f32[2,8,32], index: 13, kind: output, shape index: {0}]   ;;  %s3232_s14 = inlined_call_operand.hbm [shape: bf16[2,4,8,128], index: 14, kind: output, shape index: {1}]  }
   0x1   :  { %3241 = sst [smem:[#allocation25_spill]] %s3220_s2 }
   0x2   :  { %3242 = sst [smem:[#allocation26_spill]] %s3221_s3 }
   0x3   :  { %3243 = sst [smem:[#allocation27_spill]] %s3224_s6 }
   0x4   :  { %3244 = sst [smem:[#allocation28_spill]] %s3225_s7 }
   0x5   :  { %3245 = sst [smem:[#allocation29_spill]] %s3226_s8 }
   0x6   :  { %3246 = sst [smem:[#allocation30_spill]] %s3231_s13 }
   0x7   :  { %20 = vsyncpa [#allocation3], 0 }
   0x8   :  { %22 = vsyncpa [#allocation3 + $0x1], 0 }
   0x9   :  { %23 = vsyncpa [#allocation6], 0 }
   0xa   :  { %24 = vsyncpa [#allocation9], 0 }
   0xb   :  { %25 = vsyncpa [#allocation12], 0 }
   0xc   :  { %26 = vsyncpa [#allocation4], 0 }
   0xd   :  { %28 = vsyncpa [#allocation4 + $0x1], 0 }
   0xe   :  { %29 = vsyncpa [#allocation15], 0 }
   0xf   :  { %31 = vsyncpa [#allocation15 + $0x1], 0  ;;  %s2756_s29 = smov 0   ;;  %s2758_s30 = smov 0  }
  0x10   :  { %s2760_s15 = smov 0   ;;  %s2762_s16 = smov 0  }
  0x11 LB: > { %3247 = sst [smem:[#allocation22_spill]] %s2653_s15  ;;  %s2659_s17 = smov [#allocation5]   ;;  %s2657_s16 = sphi %s2762_s16, %s3275_s16   ;;  %s2653_s15 = sphi %s2760_s15, %s3277_s15   ;;  %s2649_s30 = sphi %s2758_s30, %s3279_s30   ;;  %s2645_s29 = sphi %s2756_s29, %s3278_s29  }
  0x12   : > { %s390_s18 = sshll.u32 %s2659_s17, 4  ;;  %s2777_s19 = sadd.s32 4294967295, %s2657_s16   ;;  %s391_s18 = int_to_ptr.vmem [resolvable:$true] %s390_s18 }
  0x13   : > { %p2041_p0 = scmp.ge.s32.totalorder %s2657_s16, 1  ;;  %p3234_p1 = scmp.eq.s32.totalorder %s2777_s19, 0 }
  0x14   : > { %p377_p2 = scmp.lt.s32.totalorder %s2657_s16, 3  ;;  %s2660_s21 = smov [#allocation8]  }
  0x15   : > { %s418_s22 = sshll.u32 %s2660_s21, 4  ;;  %s2661_s23 = smov [#allocation7]   ;;  %s2789_s22 = int_to_ptr.vmem [resolvable:$true] %s418_s22 }
  0x16   : > { %p2782_p3 = pnand %p2041_p0, %p377_p2  ;;  %s401_s24 = sshll.u32 %s2661_s23, 4  ;;  %s2797_s24 = int_to_ptr.vmem [resolvable:$true] %s401_s24 }
  0x17   : > { %s2662_s26 = smov [#allocation10]   ;;  %s2404_s17 = scalar_lea.vmem %s391_s18, 16 }
  0x18   : > { %s3248_s20 = scalar_select %p2782_p3, 1, 0 }
  0x19   : > { %p2245_p5 = pneg %p2782_p3  ;;  %s2799_s27 = sshll.u32 %s2662_s26, 4  ;;  %s430_s27 = int_to_ptr.vmem [resolvable:$true] %s2799_s27 }
  0x1a   : > { %p2405_p8 = scmp.ne.s32.totalorder %s391_s18, %s2404_s17  ;;  %s2411_s21 = scalar_lea.vmem %s391_s18, 32 }
  0x1b   : > { %p2793_p6 = pnand %p2245_p5, %p3234_p1  ;;  %p2412_p11 = scmp.lt.s32.totalorder %s391_s18, %s391_s18 }
  0x1c   : > { %p2413_p12 = scmp.lt.s32.totalorder %s2411_s21, %s2404_s17 }
  0x1d   : > { %p2803_p7 = pneg %p2793_p6 }
  0x1e   : > { %p2414_p13 = por %p2413_p12, %p2412_p11 }
  0x1f   : > { %p2407_p9 = pnand %p2405_p8, %p2803_p7 }
  0x21   : > { %p2408_p10 = pneg %p2407_p9 }
  0x23   : > { %p2415_p0 = pnand %p2414_p13, %p2408_p10 }
  0x25   : > { %2418 = shalt.err (!%p2415_p0)
}
  0x26   : > { %s3251_s2 = sld [smem:[#allocation25_spill]]  ;;  %s2430_s13 = scalar_lea.vmem %s2789_s22, 16 }
  0x27   : > { %p2431_p2 = scmp.ne.s32.totalorder %s2789_s22, %s2430_s13  ;;  %s2437_s17 = scalar_lea.vmem %s2789_s22, 32 }
  0x28   : > { %p2438_p9 = scmp.lt.s32.totalorder %s2789_s22, %s2789_s22  ;;  %p2439_p10 = scmp.lt.s32.totalorder %s2437_s17, %s2430_s13 }
  0x29   : > { %p2433_p5 = pnand %p2431_p2, %p2803_p7 }
  0x2a   : > { %p2440_p11 = por %p2439_p10, %p2438_p9 }
  0x2b   : > { %p2434_p8 = pneg %p2433_p5 }
  0x2c   : > { %2248 = dma.hbm_to_vmem [thread:$0]  (!%p2793_p6), %s3251_s2, 16, %s391_s18, [#allocation6]  }
  0x2d   : > { %p2441_p12 = pnand %p2440_p11, %p2434_p8 }
  0x2f   : > { %2444 = shalt.err (!%p2441_p12)
}
  0x30   : > { %s3252_s6 = sld [smem:[#allocation27_spill]]  ;;  %s2456_s18 = scalar_lea.vmem %s2797_s24, 16 }
  0x31   : > { %p2457_p13 = scmp.ne.s32.totalorder %s2797_s24, %s2456_s18  ;;  %s2463_s13 = scalar_lea.vmem %s2797_s24, 32 }
  0x32   : > { %p2464_p5 = scmp.lt.s32.totalorder %s2797_s24, %s2797_s24  ;;  %p2465_p8 = scmp.lt.s32.totalorder %s2463_s13, %s2456_s18 }
  0x33   : > { %p2459_p0 = pnand %p2457_p13, %p2803_p7 }
  0x34   : > { %p2466_p9 = por %p2465_p8, %p2464_p5 }
  0x35   : > { %p2460_p2 = pneg %p2459_p0 }
  0x36   : > { %2254 = dma.hbm_to_vmem [thread:$0]  (!%p2793_p6), %s3252_s6, 16, %s2789_s22, [#allocation9]  }
  0x37   : > { %p2467_p10 = pnand %p2466_p9, %p2460_p2 }
  0x39   : > { %2470 = shalt.err (!%p2467_p10)
}
  0x3a   : > { %s3253_s3 = sld [smem:[#allocation26_spill]]  ;;  %s2663_s22 = smov [#allocation11]  }
  0x3b   : > { %s440_s21 = sshll.u32 %s2663_s22, 4  ;;  %s2482_s23 = scalar_lea.vmem %s430_s27, 16  ;;  %s441_s21 = int_to_ptr.vmem [resolvable:$true] %s440_s21 }
  0x3c   : > { %p2483_p11 = scmp.ne.s32.totalorder %s430_s27, %s2482_s23  ;;  %s2489_s18 = scalar_lea.vmem %s430_s27, 32 }
  0x3d   : > { %p2490_p0 = scmp.lt.s32.totalorder %s430_s27, %s430_s27  ;;  %p2491_p2 = scmp.lt.s32.totalorder %s2489_s18, %s2482_s23 }
  0x3e   : > { %p2485_p12 = pnand %p2483_p11, %p2803_p7 }
  0x3f   : > { %p2492_p5 = por %p2491_p2, %p2490_p0 }
  0x40   : > { %2251 = dma.hbm_to_vmem [thread:$0]  (!%p2793_p6), %s3253_s3, 16, %s2797_s24, [#allocation6]  }
  0x41   : > { %p2486_p13 = pneg %p2485_p12 }
  0x43   : > { %p2493_p8 = pnand %p2492_p5, %p2486_p13 }
  0x45   : > { %2496 = shalt.err (!%p2493_p8)
}
  0x46   : > { %s3254_s7 = sld [smem:[#allocation28_spill]]  ;;  %s2508_s24 = scalar_lea.vmem %s441_s21, 16 }
  0x47   : > { %p2509_p9 = scmp.ne.s32.totalorder %s441_s21, %s2508_s24  ;;  %s2515_s17 = scalar_lea.vmem %s441_s21, 32 }
  0x48   : > { %p2516_p12 = scmp.lt.s32.totalorder %s441_s21, %s441_s21  ;;  %p2517_p4 = scmp.lt.s32.totalorder %s2515_s17, %s2508_s24 }
  0x49   : > { %p2511_p10 = pnand %p2509_p9, %p2803_p7 }
  0x4a   : > { %p2518_p1 = por %p2517_p4, %p2516_p12 }
  0x4b   : > { %p2512_p11 = pneg %p2511_p10 }
  0x4c   : > { %2257 = dma.hbm_to_vmem [thread:$0]  (!%p2793_p6), %s3254_s7, 16, %s430_s27, [#allocation9]  }
  0x4d   : > { %p2519_p0 = pnand %p2518_p1, %p2512_p11 }
  0x4f   : > { %2522 = shalt.err (!%p2519_p0)
}
  0x50   : > { %s3255_s8 = sld [smem:[#allocation29_spill]]  ;;  %s2040_s27 = sadd.s32 4294967294, %s2657_s16  }
  0x51   : > { %s2857_s25 = sadd.s32 1, %s2657_s16   ;;  %s70_s28 = sadd.s32 1, %s2653_s15 }
  0x52   : > { %3256 = sst [smem:[#allocation23_spill]] %s2857_s25  ;;  %s67_s18 = ssub.s32 %s2657_s16, %s2857_s25 }
  0x53   : > { %p77_p1 = scmp.ne.s32.totalorder %s2653_s15, %s2649_s30  ;;  %p68_p4 = scmp.eq.s32.totalorder %s67_s18, 0 }
  0x54   : > { %p78_p7 = scmp.eq.s32.totalorder %s2657_s16, 0  ;;  %p83_p13 = scmp.ne.s32.totalorder %s2649_s30, %s2645_s29 }
  0x55   : > { %p338_p2 = scmp.eq.s32.totalorder %s2777_s19, 1  ;;  %p3258_p8 = scmp.eq.s32.totalorder %s2777_s19, 0 }
  0x56   : > { %2260 = dma.hbm_to_vmem [thread:$0]  (!%p2793_p6), %s3255_s8, 16, %s441_s21, [#allocation12]  }
  0x57   : > { %s2869_s13 = scalar_select %p68_p4, %s2653_s15, %s70_s28  }
  0x58   : > { %p79_p5 = por %p78_p7, %p77_p1  ;;  %p2873_p9 = por %p3258_p8, %p83_p13 }
  0x59   : > { %3257 = sst [smem:[#allocation24_spill]] %s2869_s13  ;;  %p2877_p6 = por %p338_p2, %p77_p1 }
  0x5a   : > { %s3259_s26 = scalar_select %p2873_p9, 1, 0 }
  0x5b   : > { %s3260_s21 = scalar_select %p2877_p6, 1, 0 }
  0x5c   : > { %p344_p10 = scmp.eq.s32.totalorder %s2040_s27, 1  ;;  %p2277_p11 = scmp.lt.s32.totalorder %s2657_s16, 2 }
  0x5d   : > { %s470_s24 = sand.u32 1, %s2653_s15   ;;  %s2048_s22 = sshll.u32 %s2657_s16, 4 }
  0x5e   : > { %p2883_p12 = por %p344_p10, %p83_p13  ;;  %s2891_s18 = scalar_lea.hbm %s3219_s1, %s2048_s22 }
  0x5f   : > { %s473_s2 = scalar_lea.vmem [#allocation2], %s470_s24  ;;  %p2893_p0 = pnand %p2277_p11, %p79_p5 }
  0x60   : > { %s3261_s17 = scalar_select %p2883_p12, 1, 0 }
  0x61   : > { %s480_s3 = sshll.u32 %s473_s2, 4  ;;  %s471_s6 = scalar_lea.sflag [#allocation3], %s470_s24  ;;  %s481_s3 = int_to_ptr.vmem [resolvable:$true] %s480_s3 }
  0x62   : > { %s2523_s7 = scalar_lea.hbm %s2891_s18, 16  ;;  %p2525_p4 = pneg %p2893_p0 }
  0x63   : > { %p2524_p1 = scmp.ne.s32.totalorder %s2891_s18, %s2523_s7  ;;  %s2528_s28 = scalar_lea.hbm %s3219_s1, 32 }
  0x64   : > { %p2529_p2 = scmp.lt.s32.totalorder %s2891_s18, %s3219_s1  ;;  %p2530_p5 = scmp.lt.s32.totalorder %s2528_s28, %s2523_s7 }
  0x65   : > { %p2526_p7 = pnand %p2525_p4, %p2524_p1 }
  0x66   : > { %p2531_p8 = por %p2530_p5, %p2529_p2 }
  0x67   : > { %p2527_p13 = pneg %p2526_p7 }
  0x69   : > { %p2532_p10 = pnand %p2531_p8, %p2527_p13 }
  0x6b   : > { %2535 = shalt.err (!%p2532_p10)
}
  0x6c   : > { %s2536_s2 = scalar_lea.vmem %s481_s3, 16  ;;  %s2664_s24 = smov [#allocation2]  }
  0x6d   : > { %p2537_p11 = scmp.ne.s32.totalorder %s481_s3, %s2536_s2  ;;  %s2541_s15 = sshll.u32 %s2664_s24, 4  ;;  %s2542_s15 = int_to_ptr.vmem [resolvable:$false] %s2541_s15 }
  0x6e   : > { %s2543_s25 = scalar_lea.vmem %s2542_s15, 32  ;;  %p2544_p1 = scmp.lt.s32.totalorder %s481_s3, %s2542_s15 }
  0x6f   : > { %p2539_p12 = pnand %p2537_p11, %p2525_p4  ;;  %p2545_p7 = scmp.lt.s32.totalorder %s2543_s25, %s2536_s2 }
  0x71   : > { %p2540_p6 = pneg %p2539_p12  ;;  %p2546_p9 = por %p2545_p7, %p2544_p1 }
  0x73   : > { %p2547_p3 = pnand %p2546_p9, %p2540_p6 }
  0x75   : > { %2550 = shalt.err (!%p2547_p3)
}
  0x76   : > { %2264 = dma.hbm_to_vmem [thread:$0]  (!%p2893_p0), %s2891_s18, 16, %s481_s3, %s471_s6  }
  0x77   : > { %p3263_p13 = scmp.ne.s32.totalorder %s3248_s20, 0 }
  0x78   : > { %s2914_s7 = sand.u32 (!%p3263_p13), 1, %s2649_s30   ;;  %p3264_p12 = scmp.ne.s32.totalorder (!%p3263_p13), %s3259_s26, 0 }
  0x79   : > { %489 = sbr.rel (%p3263_p13) target bundleno = 2938 (0xb7a), region = 72  ;;  %s492_s8 = scalar_lea.sflag (!%p3263_p13), [#allocation3], %s2914_s7 }
  0x7a   : > { %s494_s13 = scalar_lea.vmem (!%p3263_p13), [#allocation2], %s2914_s7 }
  0x7e   : > { %2620 = dma.done.wait (%p3264_p12), %s492_s8, 16  }
  0x7f   : > { %2622 = vsyncadd (%p3264_p12), %s492_s8, 4294967280  ;;  %p3265_p3 = scmp.eq.s32.totalorder %s2777_s19, 0 }
  0x81   : > { %2624 = dma.done.wait (%p3265_p3), [#allocation6], 32   ;;  %p3266_p9 = pmov %p3265_p3 }
  0x82   : > { %p3267_p6 = pmov %p3265_p3 }
  0x83   : > { %2626 = vsyncadd (%p3266_p9), [#allocation6], 4294967264 }
  0x84   : > { %2628 = dma.done.wait (%p3267_p6), [#allocation9], 32   ;;  %p3268_p0 = pmov %p3265_p3 }
  0x86   : > { %2630 = vsyncadd (%p3268_p0), [#allocation9], 4294967264  ;;  %p3269_p4 = pmov %p3268_p0 }
  0x87   : > { %p3270_p2 = pmov %p3268_p0 }
  0x88   : > { %2632 = dma.done.wait (%p3269_p4), [#allocation12], 16  }
  0x89   : > { %2634 = vsyncadd (%p3270_p2), [#allocation12], 4294967280  ;;  %p567_p5 = scmp.lt.s32.totalorder %s2777_s19, 1  ;;  %vm575_vm0 = vcmask 261120   ;;  %v2355_v7 = vld [vmem:[%s3222_s4 + $0x8] sm:$0xff]   ;;  %v2665_v8 = vmov 0.0   ;;  %v965_v58 = vlaneseq }
  0x8a   : > { %2135 = vmatprep.subr.bf16.mxu0 %v2665_v8  ;;  %vm2666_vm1 = vmmov 0   ;;  %v2356_v9 = vld [vmem:[%s3222_s4] sm:$0xff]   ;;  %2143 = vmatprep.subr.bf16.mxu1 %v2665_v8  ;;  %vm667_vm2 = vcmask 1043456   ;;  %s2667_s23 = smov 112   ;;  %s2668_s28 = smov 120   ;;  %v2669_v28 = vmov 0  }
  0x8b   : > { %s568_s3 = scalar_select %p567_p5, %s2777_s19, 1  ;;  %2139 = vmatprep.mubr.msk.bf16.mxu0 %vm2666_vm1, %v2665_v8  ;;  %2136 = vmatpush3.bf16.msra.mxu0 %v2355_v7  ;;  %v2058_v14 = vld [vmem:[#allocation5] ss:$0 sm:$0xff]  ;;  %v2059_v16 = vld [vmem:[#allocation7] ss:$0 sm:$0xff]  ;;  %vm780_vm3 = vcmask 64512  }
  0x8c   : > { %2137 = vmatprep.subr.bf16.mxu0 %v2665_v8  ;;  %2145 = vmatprep.mubr.msk.bf16.mxu1 %vm2666_vm1, %v2665_v8  ;;  %s2670_s2 = smov 104   ;;  %s2671_s24 = smov 96   ;;  %v3008_v59 = vand.u32 127, %v965_v58  ;;  %vm1591_vm6 = vcmask 130048   ;;  %vm1593_vm7 = vcmask 195584   ;;  %vm1800_vm8 = vcmask 523264  }
  0x8d   : > { %s2057_s6 = sshll.u32 %s568_s3, 3  ;;  %s2672_s8 = smov 64  }
  0x8e   : > { %s570_s25 = scalar_lea.vmem %s3218_s0, %s2057_s6  ;;  %vm969_vm4 = vcmp.lt.s32.totalorder %v3008_v59, 8  ;;  %s2675_s20 = smov 16  }
  0x8f   : > { %v2939_v0 = vld [vmem:[%s570_s25] sm:$0xff]  ;;  %2138 = vmatpush3.bf16.msra.mxu0 %v2356_v9  ;;  %s2676_s25 = smov 8   ;;  %s2677_s26 = smov 24  }
  0x90   : > { %v576_v1 = vsel %vm575_vm0, %v2939_v0, 0.0  ;;  %2167 = vmatprep.subr.bf16.mxu0 %v2665_v8  ;;  %s2056_s18 = sshll.u32 %s2914_s7, 4  ;;  %s1852_s3 = scalar_lea.sflag [#allocation15], %s2914_s7 }
  0x91   : > { %577 = vadd.xlane.f32.xlu0 %v576_v1  ;;  %s3099_s27 = scalar_lea.vmem [#allocation14], %s2056_s18  ;;  %p3271_p10 = scmp.ne.s32.totalorder %s3260_s21, 0 }
  0x92   : > { %s2678_s15 = smov [#allocation14]  }
 0x11a   : > { %v578_v2 = vpop.xlane.xlu0 %577 }
 0x11b   : > { %v580_v3 = vmul.f32 0.03125, %v578_v2 }
 0x11d   : > { %v581_v4 = vsub.f32 %v2939_v0, %v580_v3 }
 0x11f   : > { %v582_v5 = vmul.f32 %v581_v4, %v581_v4 }
 0x121   : > { %v583_v6 = vsel %vm575_vm0, %v582_v5, 0.0 }
 0x122   : > { %584 = vadd.xlane.f32.xlu0 %v583_v6 }
 0x1ab   : > { %v585_v10 = vpop.xlane.xlu0 %584 }
 0x1ac   : > { %v586_v11 = vmul.f32 0.03125, %v585_v10 }
 0x1ae   : > { %v587_v12 = vadd.f32 1e-05, %v586_v11 }
 0x1b0   : > { %2365 = vrsqrt.f32 %v587_v12 }
 0x1bd   : > { %v2366_v13 = vpop.eup %2365 }
 0x1be   : > { %v589_v15 = vmul.f32 %v2366_v13, %v581_v4 }
 0x1c0   : > { %v596_v17 = vmul.f32 %v2058_v14, %v589_v15 }
 0x1c2   : > { %v603_v18 = vadd.f32 %v2059_v16, %v596_v17 }
 0x1c4   : > { %v604_v19 = vpack.c.bf16 %v603_v18, %v603_v18 }
 0x1c6   : > { %2140 = vmatmul.mubr.msk.bf16.vlgmr.msra.gmra.mxu0 %vm575_vm0, %v604_v19 }
 0x1c7   : > { %2169 = vmatprep.mubr.msk.bf16.mxu0 %vm2666_vm1, %v2665_v8 }
 0x286   : > { %v658_v20 = vpop.f32.mrf.mxu0 }
 0x287   : > { %v666_v21 = vpack.c.bf16 %v658_v20, %v658_v20  ;;  %v664_v22 = vmul.f32 0.35355338, %v658_v20 }
 0x288   : > { %v2141_v23 = vpop.f32.mrf.mxu0 }
 0x289   : > { %v2963_v24 = vsel %vm667_vm2, %v666_v21, 0  ;;  %v2967_v26 = vpack.c.bf16 %v664_v22, %v664_v22 }
 0x28a   : > { %684 = vrot.lane.b32.xlu0 %v2963_v24, %s2667_s23  ;;  %680 = vrot.lane.b32.xlu1 %v2963_v24, %s2668_s28  ;;  %v661_v25 = vpop.f32.mrf.mxu0 }
 0x28c   : > { %v2142_v27 = vpop.f32.mrf.mxu0 }
 0x28e   : > { %682 = vrot.lane.b32.xlu1 %v2669_v28, %s2668_s28  ;;  %674 = vrot.lane.b32.xlu0 %v2967_v26, %s2667_s23 }
 0x292   : > { %686 = vrot.lane.b32.xlu1 %v2669_v28, %s2667_s23  ;;  %676 = vrot.lane.b32.xlu0 %v2967_v26, %s2670_s2  ;;  %s2093_s23 = sshll.u32 %s2777_s19, 8 }
 0x296   : > { %688 = vrot.lane.b32.xlu1 %v2963_v24, %s2670_s2 }
 0x29a   : > { %690 = vrot.lane.b32.xlu1 %v2669_v28, %s2670_s2 }
 0x2fc   : > { %v2972_v29 = vpop.permute.xlu0 %684  ;;  %v681_v30 = vpop.permute.xlu1 %680 }
 0x2fd   : > { %700 = vrot.lane.b32.xlu0 %v2972_v29, %s2671_s24 }
 0x300   : > { %v683_v31 = vpop.permute.xlu1 %682  ;;  %v675_v44 = vpop.permute.xlu0 %674 }
 0x301   : > { %v2335_v32 = vpack.i.bf16 %v683_v31, %v2669_v28  ;;  %v2067_v31 = vld [vmem:[%s494_s13] ss:$0 sm:$0xff]  ;;  %s3136_s13 = scalar_lea.hbm %s3232_s14, %s2093_s23 }
 0x303   : > { %2336 = vrot.lane.b32.xlu1 %v2335_v32, %s2671_s24 }
 0x304   : > { %v687_v33 = vpop.permute.xlu1 %686  ;;  %v677_v45 = vpop.permute.xlu0 %676 }
 0x308   : > { %v2975_v34 = vpop.permute.xlu1 %688 }
 0x309   : > { %704 = vrot.lane.b32.xlu0 %v2975_v34, %s2671_s24 }
 0x30c   : > { %v691_v35 = vpop.permute.xlu1 %690 }
 0x30d   : > { %v2978_v36 = vpack.i.bf16 %v691_v35, %v687_v33 }
 0x30f   : > { %2341 = vrot.lane.b32.xlu1 %v2978_v36, %s2671_s24 }
 0x313   : > { %692 = vrot.lane.b32.xlu1 %v2963_v24, %s2671_s24 }
 0x317   : > { %672 = vrot.lane.b32.xlu1 %v2967_v26, %s2668_s28  ;;  %s1878_s28 = sshll.u32 %s3099_s27, 4  ;;  %s3138_s28 = int_to_ptr.vmem [resolvable:$true] %s1878_s28 }
 0x318   : > { %s2551_s6 = scalar_lea.vmem %s3138_s28, 256 }
 0x319   : > { %p2552_p8 = scmp.ne.s32.totalorder %s3138_s28, %s2551_s6 }
 0x31b   : > { %696 = vrot.lane.b32.xlu1 %v681_v30, %s2671_s24  ;;  %p2553_p11 = pnand %p2552_p8, %p3271_p10 }
 0x31d   : > { %p2554_p1 = pneg %p2553_p11 }
 0x36f   : > { %v701_v46 = vpop.permute.xlu0 %700 }
 0x375   : > { %v2337_v37 = vpop.permute.xlu1 %2336 }
 0x376   : > { %v2338_v40 = vunpack.i.l.bf16 %v2337_v37  ;;  %v2339_v43 = vunpack.i.h.bf16 %v2337_v37 }
 0x37b   : > { %v705_v48 = vpop.permute.xlu0 %704 }
 0x381   : > { %v2342_v38 = vpop.permute.xlu1 %2341 }
 0x382   : > { %v2343_v47 = vunpack.i.l.bf16 %v2342_v38  ;;  %v2344_v49 = vunpack.i.h.bf16 %v2342_v38 }
 0x385   : > { %v693_v39 = vpop.permute.xlu1 %692 }
 0x386   : > { %716 = vxpose.xlu1.c.b16.start [1/8] (narrow) %v693_v39, 16 }
 0x389   : > { %v673_v41 = vpop.permute.xlu1 %672 }
 0x38a   : > { %717 = vxpose.xlu1.c.b16.cont [2/8] (narrow) %v2338_v40, 16 }
 0x38d   : > { %v697_v42 = vpop.permute.xlu1 %696 }
 0x38e   : > { %718 = vxpose.xlu1.c.b16.cont [3/8] (narrow) %v2338_v40, 16  ;;  %732 = vxpose.xlu0.c.b16.start [1/8] (narrow) %v697_v42, 16 }
 0x392   : > { %719 = vxpose.xlu1.c.b16.cont [4/8] (narrow) %v2338_v40, 16  ;;  %733 = vxpose.xlu0.c.b16.cont [2/8] (narrow) %v2339_v43, 16 }
 0x396   : > { %720 = vxpose.xlu1.c.b16.cont [5/8] (narrow) %v2338_v40, 16  ;;  %734 = vxpose.xlu0.c.b16.cont [3/8] (narrow) %v2339_v43, 16 }
 0x39a   : > { %721 = vxpose.xlu1.c.b16.cont [6/8] (narrow) %v2338_v40, 16  ;;  %735 = vxpose.xlu0.c.b16.cont [4/8] (narrow) %v2339_v43, 16 }
 0x39e   : > { %722 = vxpose.xlu1.c.b16.cont [7/8] (narrow) %v2338_v40, 16  ;;  %736 = vxpose.xlu0.c.b16.cont [5/8] (narrow) %v2339_v43, 16 }
 0x3a2   : > { %723 = vxpose.xlu1.c.b16.end [8/8] (narrow) %v2338_v40, 16  ;;  %737 = vxpose.xlu0.c.b16.cont [6/8] (narrow) %v2339_v43, 16 }
 0x3a6   : > { %748 = vxpose.xlu1.c.b16.start [1/8] (narrow) %v701_v46, 16  ;;  %738 = vxpose.xlu0.c.b16.cont [7/8] (narrow) %v2339_v43, 16 }
 0x3aa   : > { %749 = vxpose.xlu1.c.b16.cont [2/8] (narrow) %v2343_v47, 16  ;;  %739 = vxpose.xlu0.c.b16.end [8/8] (narrow) %v2339_v43, 16 }
 0x3ae   : > { %750 = vxpose.xlu1.c.b16.cont [3/8] (narrow) %v2343_v47, 16  ;;  %764 = vxpose.xlu0.c.b16.start [1/8] (narrow) %v705_v48, 16 }
 0x3b2   : > { %751 = vxpose.xlu1.c.b16.cont [4/8] (narrow) %v2343_v47, 16  ;;  %765 = vxpose.xlu0.c.b16.cont [2/8] (narrow) %v2344_v49, 16 }
 0x3b6   : > { %752 = vxpose.xlu1.c.b16.cont [5/8] (narrow) %v2343_v47, 16  ;;  %766 = vxpose.xlu0.c.b16.cont [3/8] (narrow) %v2344_v49, 16 }
 0x3ba   : > { %753 = vxpose.xlu1.c.b16.cont [6/8] (narrow) %v2343_v47, 16  ;;  %767 = vxpose.xlu0.c.b16.cont [4/8] (narrow) %v2344_v49, 16 }
 0x3be   : > { %754 = vxpose.xlu1.c.b16.cont [7/8] (narrow) %v2343_v47, 16  ;;  %768 = vxpose.xlu0.c.b16.cont [5/8] (narrow) %v2344_v49, 16 }
 0x3c2   : > { %755 = vxpose.xlu1.c.b16.end [8/8] (narrow) %v2343_v47, 16  ;;  %769 = vxpose.xlu0.c.b16.cont [6/8] (narrow) %v2344_v49, 16 }
 0x3c6   : > { %1066 = vrot.lane.b32.xlu1 %v2963_v24, %s2672_s8  ;;  %770 = vxpose.xlu0.c.b16.cont [7/8] (narrow) %v2344_v49, 16 }
 0x3ca   : > { %2346 = vrot.lane.b32.xlu1 %v2335_v32, %s2672_s8  ;;  %771 = vxpose.xlu0.c.b16.end [8/8] (narrow) %v2344_v49, 16 }
 0x3d3   : > { %1070 = vrot.lane.b32.xlu0 %v681_v30, %s2672_s8  ;;  %v3025_v30 = vshrl.u32 %v965_v58, 7 }
 0x3d5   : > { %vm1021_vm5 = vcmp.eq.s32.totalorder %v3025_v30, %v3008_v59 }
 0x3e8   : > { %v724_v50 = vpop.trf.xlu1 }
 0x3e9   : > { %v785_v51 = vsel %vm667_vm2, %v724_v50, 0 }
 0x3ea   : > { %2144 = vmatpush3.bf16.msra.mxu1 %v785_v51 }
 0x3eb   : > { %2149 = vmatprep.subr.bf16.mxu1 %v2665_v8 }
 0x3ed   : > { %2146 = vmatmul.mubr.msk.bf16.vlgmr.msra.gmra.mxu1 %vm780_vm3, %v2967_v26 }
 0x3ee   : > { %2151 = vmatprep.mubr.msk.bf16.mxu1 %vm2666_vm1, %v2665_v8 }
 0x3f0   : > { %v740_v52 = vpop.trf.xlu0 }
 0x3f1   : > { %v831_v53 = vsel %vm667_vm2, %v740_v52, 0 }
 0x3f2   : > { %2150 = vmatpush3.bf16.msra.mxu1 %v831_v53 }
 0x3f3   : > { %2155 = vmatprep.subr.bf16.mxu1 %v2665_v8 }
 0x3f5   : > { %2152 = vmatmul.mubr.msk.bf16.vlgmr.msra.gmra.mxu1 %vm780_vm3, %v673_v41 }
 0x3f6   : > { %2157 = vmatprep.mubr.msk.bf16.mxu1 %vm2666_vm1, %v2665_v8 }
 0x408   : > { %v756_v54 = vpop.trf.xlu1 }
 0x409   : > { %v877_v55 = vsel %vm667_vm2, %v756_v54, 0 }
 0x40a   : > { %2156 = vmatpush3.bf16.msra.mxu1 %v877_v55 }
 0x40b   : > { %2161 = vmatprep.subr.bf16.mxu1 %v2665_v8 }
 0x40d   : > { %2158 = vmatmul.mubr.msk.bf16.vlgmr.msra.gmra.mxu1 %vm780_vm3, %v675_v44 }
 0x40e   : > { %2163 = vmatprep.mubr.msk.bf16.mxu1 %vm2666_vm1, %v2665_v8 }
 0x410   : > { %v772_v56 = vpop.trf.xlu0 }
 0x411   : > { %v923_v57 = vsel %vm667_vm2, %v772_v56, 0 }
 0x412   : > { %2162 = vmatpush3.bf16.msra.mxu1 %v923_v57 }
 0x413   : > { %2173 = vmatprep.subr.bf16.mxu1 %v2665_v8 }
 0x415   : > { %2164 = vmatmul.mubr.msk.bf16.vlgmr.msra.gmra.mxu1 %vm780_vm3, %v677_v45 }
 0x416   : > { %2175 = vmatprep.mubr.msk.bf16.mxu1 %vm2666_vm1, %v2665_v8 }
 0x438   : > { %v1067_v18 = vpop.permute.xlu1 %1066 }
 0x43c   : > { %v2347_v19 = vpop.permute.xlu1 %2346 }
 0x43d   : > { %v2348_v20 = vunpack.i.l.bf16 %v2347_v19  ;;  %v2349_v22 = vunpack.i.h.bf16 %v2347_v19 }
 0x445   : > { %v1071_v21 = vpop.permute.xlu0 %1070 }
 0x4ad   : > { %v821_v60 = vpop.f32.mrf.mxu1 }
 0x4ae   : > { %v972_v61 = vsel %vm969_vm4, %v821_v60, -1e+30 }
 0x4af   : > { %976 = vmax.xlane.f32.xlu1 %v972_v61  ;;  %v2147_v62 = vpop.f32.mrf.mxu1 }
 0x4b1   : > { %v824_v63 = vpop.f32.mrf.mxu1 }
 0x4b3   : > { %v2148_v1 = vpop.f32.mrf.mxu1 }
 0x4b5   : > { %v867_v2 = vpop.f32.mrf.mxu1 }
 0x4b6   : > { %v973_v3 = vsel %vm969_vm4, %v867_v2, -1e+30 }
 0x4b7   : > { %978 = vmax.xlane.f32.xlu0 %v973_v3  ;;  %v2153_v4 = vpop.f32.mrf.mxu1 }
 0x4b9   : > { %v870_v5 = vpop.f32.mrf.mxu1 }
 0x4bb   : > { %v2154_v6 = vpop.f32.mrf.mxu1 }
 0x4cd   : > { %v913_v7 = vpop.f32.mrf.mxu1 }
 0x4ce   : > { %v974_v9 = vsel %vm969_vm4, %v913_v7, -1e+30 }
 0x4cf   : > { %980 = vmax.xlane.f32.xlu1 %v974_v9  ;;  %v2159_v10 = vpop.f32.mrf.mxu1 }
 0x4d1   : > { %v916_v11 = vpop.f32.mrf.mxu1 }
 0x4d3   : > { %v2160_v12 = vpop.f32.mrf.mxu1 }
 0x4d5   : > { %v959_v13 = vpop.f32.mrf.mxu1 }
 0x4d6   : > { %v975_v14 = vsel %vm969_vm4, %v959_v13, -1e+30 }
 0x4d7   : > { %982 = vmax.xlane.f32.xlu0 %v975_v14  ;;  %v2165_v15 = vpop.f32.mrf.mxu1 }
 0x4d9   : > { %v962_v16 = vpop.f32.mrf.mxu1 }
 0x4db   : > { %v2166_v17 = vpop.f32.mrf.mxu1 }
 0x4fc   : > { %1090 = vxpose.xlu1.c.b16.start [1/8] (narrow) %v1067_v18, 16 }
 0x500   : > { %1091 = vxpose.xlu1.c.b16.cont [2/8] (narrow) %v2348_v20, 16 }
 0x504   : > { %1106 = vxpose.xlu0.c.b16.start [1/8] (narrow) %v1071_v21, 16  ;;  %1092 = vxpose.xlu1.c.b16.cont [3/8] (narrow) %v2348_v20, 16 }
 0x508   : > { %1107 = vxpose.xlu0.c.b16.cont [2/8] (narrow) %v2349_v22, 16  ;;  %1093 = vxpose.xlu1.c.b16.cont [4/8] (narrow) %v2348_v20, 16 }
 0x50c   : > { %1108 = vxpose.xlu0.c.b16.cont [3/8] (narrow) %v2349_v22, 16  ;;  %1094 = vxpose.xlu1.c.b16.cont [5/8] (narrow) %v2348_v20, 16 }
 0x510   : > { %1109 = vxpose.xlu0.c.b16.cont [4/8] (narrow) %v2349_v22, 16  ;;  %1095 = vxpose.xlu1.c.b16.cont [6/8] (narrow) %v2348_v20, 16 }
 0x514   : > { %1110 = vxpose.xlu0.c.b16.cont [5/8] (narrow) %v2349_v22, 16  ;;  %1096 = vxpose.xlu1.c.b16.cont [7/8] (narrow) %v2348_v20, 16 }
 0x518   : > { %1111 = vxpose.xlu0.c.b16.cont [6/8] (narrow) %v2349_v22, 16  ;;  %1097 = vxpose.xlu1.c.b16.end [8/8] (narrow) %v2348_v20, 16 }
 0x51c   : > { %1112 = vxpose.xlu0.c.b16.cont [7/8] (narrow) %v2349_v22, 16  ;;  %1074 = vrot.lane.b32.xlu1 %v2972_v29, %s2672_s8 }
 0x520   : > { %1113 = vxpose.xlu0.c.b16.end [8/8] (narrow) %v2349_v22, 16  ;;  %2351 = vrot.lane.b32.xlu1 %v2978_v36, %s2672_s8 }
 0x529   : > { %1078 = vrot.lane.b32.xlu0 %v2975_v34, %s2672_s8 }
 0x538   : > { %v977_v23 = vpop.xlane.xlu1 %976 }
 0x539   : > { %v984_v24 = vsub.f32 %v972_v61, %v977_v23 }
 0x53b   : > { %v988_v25 = vmul.f32 1.442695, %v984_v24 }
 0x53d   : > { %2367 = vpow2.f32 %v988_v25 }
 0x540   : > { %v979_v26 = vpop.xlane.xlu0 %978 }
 0x541   : > { %v985_v27 = vsub.f32 %v973_v3, %v979_v26 }
 0x543   : > { %v990_v28 = vmul.f32 1.442695, %v985_v27 }
 0x545   : > { %2369 = vpow2.f32 %v990_v28 }
 0x54a   : > { %v3029_v29 = vpop.eup %2367 }
 0x54b   : > { %v1028_v32 = vmul.f32 %v3029_v29, %v2067_v31 }
 0x54d   : > { %v1034_v33 = vsel %vm1021_vm5, %v3029_v29, %v1028_v32 }
 0x54e   : > { %1042 = vadd.xlane.f32.xlu0 %v1034_v33  ;;  %v1038_v60 = vadd.f32 1.25e-07, %v1034_v33 }
 0x552   : > { %v3038_v34 = vpop.eup %2369 }
 0x553   : > { %v1029_v35 = vmul.f32 %v3038_v34, %v2067_v31 }
 0x555   : > { %v1035_v36 = vsel %vm1021_vm5, %v3038_v34, %v1029_v35 }
 0x556   : > { %1044 = vadd.xlane.f32.xlu1 %v1035_v36  ;;  %v1039_v1 = vadd.f32 1.25e-07, %v1035_v36 }
 0x558   : > { %v981_v37 = vpop.xlane.xlu1 %980 }
 0x559   : > { %v986_v38 = vsub.f32 %v974_v9, %v981_v37 }
 0x55b   : > { %v992_v39 = vmul.f32 1.442695, %v986_v38 }
 0x55d   : > { %2371 = vpow2.f32 %v992_v39 }
 0x55e   : > { %v1098_v49 = vpop.trf.xlu1 }
 0x560   : > { %v983_v40 = vpop.xlane.xlu0 %982 }
 0x561   : > { %v987_v41 = vsub.f32 %v975_v14, %v983_v40  ;;  %v2673_v40 = vmov 1983009808  }
 0x563   : > { %v994_v42 = vmul.f32 1.442695, %v987_v41  ;;  %v1445_v41 = vunpack.c.l.s4 %v2673_v40 }
 0x565   : > { %2373 = vpow2.f32 %v994_v42  ;;  %v2674_v42 = vmov 1934713408  }
 0x566   : > { %v1114_v53 = vpop.trf.xlu0 }
 0x56a   : > { %v3045_v43 = vpop.eup %2371 }
 0x56b   : > { %v1030_v44 = vmul.f32 %v3045_v43, %v2067_v31 }
 0x56d   : > { %v1036_v45 = vsel %vm1021_vm5, %v3045_v43, %v1030_v44  ;;  %v1477_v44 = vunpack.c.l.s4 %v2674_v42 }
 0x56e   : > { %1046 = vadd.xlane.f32.xlu0 %v1036_v45  ;;  %v1040_v10 = vadd.f32 1.25e-07, %v1036_v45 }
 0x572   : > { %v3052_v46 = vpop.eup %2373 }
 0x573   : > { %v1031_v47 = vmul.f32 %v3052_v46, %v2067_v31 }
 0x575   : > { %v1037_v48 = vsel %vm1021_vm5, %v3052_v46, %v1031_v47  ;;  %v1446_v47 = vunpack.c.0.s8 %v1445_v41 }
 0x576   : > { %1048 = vadd.xlane.f32.xlu0 %v1037_v48  ;;  %v1041_v14 = vadd.f32 1.25e-07, %v1037_v48 }
 0x58e   : > { %v1075_v50 = vpop.permute.xlu1 %1074 }
 0x58f   : > { %1122 = vxpose.xlu1.c.b16.start [1/8] (narrow) %v1075_v50, 16  ;;  %v1449_v50 = vsub.s32 %v1446_v47, %v3025_v30 }
 0x592   : > { %v2352_v51 = vpop.permute.xlu1 %2351 }
 0x593   : > { %v2353_v52 = vunpack.i.l.bf16 %v2352_v51  ;;  %v2354_v55 = vunpack.i.h.bf16 %v2352_v51 }
 0x595   : > { %1123 = vxpose.xlu1.c.b16.cont [2/8] (narrow) %v2353_v52, 16 }
 0x599   : > { %1124 = vxpose.xlu1.c.b16.cont [3/8] (narrow) %v2353_v52, 16 }
 0x59b   : > { %v1079_v54 = vpop.permute.xlu0 %1078 }
 0x59d   : > { %1125 = vxpose.xlu1.c.b16.cont [4/8] (narrow) %v2353_v52, 16 }
 0x5a1   : > { %1126 = vxpose.xlu1.c.b16.cont [5/8] (narrow) %v2353_v52, 16 }
 0x5a3   : > { %1138 = vxpose.xlu0.c.b16.start [1/8] (narrow) %v1079_v54, 16 }
 0x5a5   : > { %1127 = vxpose.xlu1.c.b16.cont [6/8] (narrow) %v2353_v52, 16 }
 0x5a7   : > { %1139 = vxpose.xlu0.c.b16.cont [2/8] (narrow) %v2354_v55, 16 }
 0x5a9   : > { %1128 = vxpose.xlu1.c.b16.cont [7/8] (narrow) %v2353_v52, 16 }
 0x5ab   : > { %1140 = vxpose.xlu0.c.b16.cont [3/8] (narrow) %v2354_v55, 16 }
 0x5ad   : > { %1129 = vxpose.xlu1.c.b16.end [8/8] (narrow) %v2353_v52, 16 }
 0x5af   : > { %1141 = vxpose.xlu0.c.b16.cont [4/8] (narrow) %v2354_v55, 16 }
 0x5b3   : > { %1142 = vxpose.xlu0.c.b16.cont [5/8] (narrow) %v2354_v55, 16 }
 0x5b7   : > { %1143 = vxpose.xlu0.c.b16.cont [6/8] (narrow) %v2354_v55, 16 }
 0x5bb   : > { %1144 = vxpose.xlu0.c.b16.cont [7/8] (narrow) %v2354_v55, 16 }
 0x5bf   : > { %1145 = vxpose.xlu0.c.b16.end [8/8] (narrow) %v2354_v55, 16 }
 0x5d7   : > { %v1043_v56 = vpop.xlane.xlu0 %1042 }
 0x5d8   : > { %v1050_v57 = vadd.f32 1e-06, %v1043_v56 }
 0x5da   : > { %2375 = vrcp.f32 %v1050_v57 }
 0x5df   : > { %v1045_v58 = vpop.xlane.xlu1 %1044 }
 0x5e0   : > { %v1051_v59 = vadd.f32 1e-06, %v1045_v58 }
 0x5e2   : > { %2377 = vrcp.f32 %v1051_v59 }
 0x5e7   : > { %v2376_v61 = vpop.eup %2375 }
 0x5e8   : > { %v1058_v62 = vmul.f32 %v2376_v61, %v1038_v60  ;;  %v2357_v61 = vld [vmem:[%s3223_s5 + $0x8] sm:$0xff]  }
 0x5ea   : > { %v1062_v63 = vpack.c.bf16 %v1058_v62, %v1058_v62 }
 0x5ec   : > { %2168 = vmatpush3.bf16.xpose.msra.mxu0 %v1062_v63 }
 0x5ed   : > { %2179 = vmatprep.subr.bf16.mxu0 %v2665_v8 }
 0x5ef   : > { %v2378_v2 = vpop.eup %2377 }
 0x5f0   : > { %v1059_v3 = vmul.f32 %v2378_v2, %v1039_v1 }
 0x5f2   : > { %v1063_v4 = vpack.c.bf16 %v1059_v3, %v1059_v3 }
 0x5f3   : > { %2170 = vmatmul.mubr.bf16.vlgmr.msra.gmra.mxu0 %v1098_v49  ;;  %v1130_v17 = vpop.trf.xlu1  ;;  %v1478_v49 = vunpack.c.0.s8 %v1477_v44 }
 0x5f4   : > { %2174 = vmatpush3.bf16.xpose.msra.mxu1 %v1063_v4  ;;  %2181 = vmatprep.mubr.msk.bf16.mxu0 %vm2666_vm1, %v2665_v8 }
 0x5f5   : > { %2185 = vmatprep.subr.bf16.mxu1 %v2665_v8  ;;  %v1481_v56 = vsub.s32 %v1478_v49, %v3025_v30  ;;  %v2358_v30 = vld [vmem:[%s3223_s5] sm:$0xff]  }
 0x5f7   : > { %v1047_v5 = vpop.xlane.xlu0 %1046 }
 0x5f8   : > { %v1052_v6 = vadd.f32 1e-06, %v1047_v5 }
 0x5fa   : > { %2379 = vrcp.f32 %v1052_v6 }
 0x5fb   : > { %2176 = vmatmul.mubr.bf16.vlgmr.msra.gmra.mxu1 %v1114_v53 }
 0x5fc   : > { %2187 = vmatprep.mubr.msk.bf16.mxu1 %vm2666_vm1, %v2665_v8 }
 0x5ff   : > { %v1049_v7 = vpop.xlane.xlu0 %1048 }
 0x600   : > { %v1053_v9 = vadd.f32 1e-06, %v1049_v7 }
 0x602   : > { %2381 = vrcp.f32 %v1053_v9 }
 0x605   : > { %v1146_v19 = vpop.trf.xlu0 }
 0x607   : > { %v2380_v11 = vpop.eup %2379 }
 0x608   : > { %v1060_v12 = vmul.f32 %v2380_v11, %v1040_v10 }
 0x60a   : > { %v1064_v13 = vpack.c.bf16 %v1060_v12, %v1060_v12 }
 0x60c   : > { %2180 = vmatpush3.bf16.xpose.msra.mxu0 %v1064_v13 }
 0x60d   : > { %2191 = vmatprep.subr.bf16.mxu0 %v2665_v8 }
 0x60f   : > { %v2382_v15 = vpop.eup %2381 }
 0x610   : > { %v1061_v16 = vmul.f32 %v2382_v15, %v1041_v14 }
 0x612   : > { %v1065_v18 = vpack.c.bf16 %v1061_v16, %v1061_v16 }
 0x613   : > { %2182 = vmatmul.mubr.bf16.vlgmr.msra.gmra.mxu0 %v1130_v17 }
 0x614   : > { %2186 = vmatpush3.bf16.xpose.msra.mxu1 %v1065_v18  ;;  %2195 = vmatprep.mubr.msk.bf16.mxu0 %vm2666_vm1, %v2665_v8 }
 0x615   : > { %2199 = vmatprep.subr.bf16.mxu1 %v2665_v8  ;;  %2192 = vmatpush3.bf16.msra.mxu0 %v2357_v61 }
 0x616   : > { %2193 = vmatprep.subr.bf16.mxu0 %v2665_v8 }
 0x619   : > { %2194 = vmatpush3.bf16.msra.mxu0 %v2358_v30 }
 0x61a   : > { %2207 = vmatprep.subr.bf16.mxu0 %v2665_v8 }
 0x61b   : > { %2188 = vmatmul.mubr.bf16.vlgmr.msra.gmra.mxu1 %v1146_v19 }
 0x61c   : > { %2203 = vmatprep.mubr.msk.bf16.mxu1 %vm2666_vm1, %v2665_v8 }
 0x6b3   : > { %v1188_v20 = vpop.f32.mrf.mxu0 }
 0x6b4   : > { %1314 = vxpose.xlu1.b32.start.end [1/1] (short) (narrow) %v1188_v20, 8 }
 0x6b5   : > { %v2171_v21 = vpop.f32.mrf.mxu0 }
 0x6b7   : > { %v1191_v22 = vpop.f32.mrf.mxu0 }
 0x6b9   : > { %v2172_v23 = vpop.f32.mrf.mxu0 }
 0x6bb   : > { %v1228_v24 = vpop.f32.mrf.mxu1 }
 0x6bc   : > { %1346 = vxpose.xlu0.b32.start.end [1/1] (short) (narrow) %v1228_v24, 8 }
 0x6bd   : > { %v2177_v25 = vpop.f32.mrf.mxu1 }
 0x6bf   : > { %v1231_v26 = vpop.f32.mrf.mxu1 }
 0x6c1   : > { %v2178_v27 = vpop.f32.mrf.mxu1 }
 0x6d3   : > { %v1268_v28 = vpop.f32.mrf.mxu0 }
 0x6d4   : > { %1378 = vxpose.xlu0.b32.start.end [1/1] (short) (narrow) %v1268_v28, 8 }
 0x6d5   : > { %v2183_v31 = vpop.f32.mrf.mxu0 }
 0x6d7   : > { %v1271_v32 = vpop.f32.mrf.mxu0 }
 0x6d9   : > { %v2184_v33 = vpop.f32.mrf.mxu0 }
 0x6db   : > { %v1308_v35 = vpop.f32.mrf.mxu1 }
 0x6dc   : > { %1410 = vxpose.xlu0.b32.start.end [1/1] (short) (narrow) %v1308_v35, 8 }
 0x6dd   : > { %v2189_v36 = vpop.f32.mrf.mxu1 }
 0x6df   : > { %v1311_v37 = vpop.f32.mrf.mxu1 }
 0x6e1   : > { %v2190_v38 = vpop.f32.mrf.mxu1 }
 0x6e2   : > { %v2070_v38 = vld [vmem:[#allocation8] ss:$0 sm:$0xff] }
 0x730   : > { %v1330_v48 = vpop.trf.xlu1 }
 0x738   : > { %v1362_v39 = vpop.trf.xlu0 }
 0x750   : > { %v1394_v45 = vpop.trf.xlu0 }
 0x751   : > { %v1442_v51 = vcombine.low %v1330_v48, %v1394_v45  ;;  %v1443_v52 = vcombine.high %v1330_v48, %v1394_v45 }
 0x753   : > { %v1450_v57 = vrot.slane %v1442_v51, %v1449_v50  ;;  %v1457_v58 = vrot.slane %v1443_v52, %v1449_v50 }
 0x758   : > { %v1426_v53 = vpop.trf.xlu0 }
 0x759   : > { %v1458_v54 = vcombine.low %v1362_v39, %v1426_v53  ;;  %v1459_v55 = vcombine.high %v1362_v39, %v1426_v53 }
 0x75b   : > { %v1466_v59 = vrot.slane %v1458_v54, %v1449_v50  ;;  %v1473_v60 = vrot.slane %v1459_v55, %v1449_v50 }
 0x75d   : > { %v1474_v62 = vcombine.low %v1450_v57, %v1466_v59  ;;  %v1475_v63 = vcombine.high %v1450_v57, %v1466_v59  ;;  %v1490_v1 = vcombine.low %v1457_v58, %v1473_v60  ;;  %v1491_v2 = vcombine.high %v1457_v58, %v1473_v60  ;;  %v2359_v59 = vld [vmem:[%s3227_s9 + $0x8] sm:$0xff]   ;;  %v2360_v60 = vld [vmem:[%s3227_s9] sm:$0xff]  }
 0x75e   : > { %2200 = vmatpush3.bf16.msra.mxu1 %v2359_v59 }
 0x75f   : > { %v1482_v3 = vrot.slane %v1474_v62, %v1481_v56  ;;  %v1489_v4 = vrot.slane %v1475_v63, %v1481_v56  ;;  %v1498_v5 = vrot.slane %v1490_v1, %v1481_v56  ;;  %v1505_v6 = vrot.slane %v1491_v2, %v1481_v56  ;;  %2201 = vmatprep.subr.bf16.mxu1 %v2665_v8 }
 0x761   : > { %v1510_v7 = vcombine.low %v1482_v3, %v1489_v4  ;;  %v2068_v9 = vcombine.high %v1482_v3, %v1489_v4  ;;  %v1526_v10 = vcombine.low %v1498_v5, %v1505_v6  ;;  %v2069_v11 = vcombine.high %v1498_v5, %v1505_v6  ;;  %v2074_v5 = vld [vmem:[#allocation10] ss:$0 sm:$0xff] }
 0x762   : > { %2202 = vmatpush3.bf16.msra.mxu1 %v2360_v60 }
 0x763   : > { %v1517_v12 = vrot.slane %v1510_v7, %v1449_v50  ;;  %v1525_v13 = vrot.slane %v2068_v9, %v1449_v50  ;;  %v1533_v14 = vrot.slane %v1526_v10, %v1449_v50  ;;  %v1541_v15 = vrot.slane %v2069_v11, %v1449_v50  ;;  %v2075_v10 = vld [vmem:[#allocation11] ss:$0 sm:$0xff] }
 0x765   : > { %v1543_v16 = vcombine.high %v1517_v12, %v1525_v13  ;;  %v1559_v17 = vcombine.high %v1533_v14, %v1541_v15  ;;  %v1542_v18 = vcombine.low %v1517_v12, %v1525_v13  ;;  %v1558_v19 = vcombine.low %v1533_v14, %v1541_v15  ;;  %v2363_v15 = vld [vmem:[%s3229_s11 + $0x8] sm:$0xff]  }
 0x767   : > { %v1557_v20 = vrot.slane %v1543_v16, %v1481_v56  ;;  %v1573_v21 = vrot.slane %v1559_v17, %v1481_v56  ;;  %v1550_v22 = vrot.slane %v1542_v18, %v1481_v56  ;;  %v1566_v23 = vrot.slane %v1558_v19, %v1481_v56 }
 0x769   : > { %v1576_v24 = vcombine.low %v1557_v20, %v1573_v21  ;;  %v1575_v25 = vcombine.high %v1550_v22, %v1566_v23  ;;  %v1574_v26 = vcombine.low %v1550_v22, %v1566_v23  ;;  %v1577_v27 = vcombine.high %v1557_v20, %v1573_v21 }
 0x76b   : > { %1583 = vrot.lane.b32.xlu0 %v1576_v24, %s2675_s20  ;;  %1579 = vrot.lane.b32.xlu1 %v1575_v25, %s2676_s25  ;;  %s2555_s20 = sshll.u32 %s2678_s15, 4  ;;  %s2556_s20 = int_to_ptr.vmem [resolvable:$false] %s2555_s20 }
 0x76c   : > { %p2558_p7 = scmp.lt.s32.totalorder %s3138_s28, %s2556_s20 }
 0x76f   : > { %1587 = vrot.lane.b32.xlu1 %v1577_v27, %s2677_s26 }
 0x7dd   : > { %v1580_v28 = vpop.permute.xlu1 %1579  ;;  %v1584_v31 = vpop.permute.xlu0 %1583 }
 0x7de   : > { %v1590_v32 = vsel %vm780_vm3, %v1574_v26, %v1580_v28 }
 0x7df   : > { %v1592_v35 = vsel %vm1591_vm6, %v1590_v32, %v1584_v31 }
 0x7e1   : > { %v1588_v33 = vpop.permute.xlu1 %1587 }
 0x7e2   : > { %v1594_v36 = vsel %vm1593_vm7, %v1592_v35, %v1588_v33 }
 0x7e3   : > { %v1595_v37 = vpack.c.bf16 %v1594_v36, %v1594_v36 }
 0x7e5   : > { %2196 = vmatmul.mubr.msk.bf16.vlgmr.msra.gmra.mxu0 %vm575_vm0, %v1595_v37 }
 0x7e6   : > { %2215 = vmatprep.mubr.msk.bf16.mxu0 %vm2666_vm1, %v2665_v8 }
 0x8a5   : > { %v1656_v39 = vpop.f32.mrf.mxu0 }
 0x8a6   : > { %v1657_v40 = vadd.f32 %v2070_v38, %v1656_v39 }
 0x8a7   : > { %v2197_v41 = vpop.f32.mrf.mxu0 }
 0x8a8   : > { %v3086_v42 = vadd.f32 %v1657_v40, %v2939_v0 }
 0x8a9   : > { %v1659_v44 = vpop.f32.mrf.mxu0 }
 0x8aa   : > { %v1665_v45 = vsel %vm575_vm0, %v3086_v42, 0.0 }
 0x8ab   : > { %1666 = vadd.xlane.f32.xlu1 %v1665_v45  ;;  %v2198_v47 = vpop.f32.mrf.mxu0 }
 0x8af   : > { %996 = vadd.xlane.f32.xlu1 %v3029_v29 }
 0x8b3   : > { %998 = vadd.xlane.f32.xlu1 %v3038_v34 }
 0x8b7   : > { %1002 = vadd.xlane.f32.xlu1 %v3052_v46 }
 0x934   : > { %v1667_v48 = vpop.xlane.xlu1 %1666 }
 0x935   : > { %v1668_v49 = vmul.f32 0.03125, %v1667_v48 }
 0x937   : > { %v1669_v50 = vsub.f32 %v3086_v42, %v1668_v49 }
 0x938   : > { %v997_v51 = vpop.xlane.xlu1 %996 }
 0x939   : > { %v1670_v0 = vmul.f32 %v1669_v50, %v1669_v50  ;;  %2383 = vrcp.f32 %v997_v51 }
 0x93b   : > { %v1671_v52 = vsel %vm575_vm0, %v1670_v0, 0.0 }
 0x93c   : > { %1672 = vadd.xlane.f32.xlu0 %v1671_v52  ;;  %v999_v53 = vpop.xlane.xlu1 %998 }
 0x93d   : > { %2385 = vrcp.f32 %v999_v53 }
 0x940   : > { %1000 = vadd.xlane.f32.xlu0 %v3045_v43  ;;  %v1003_v62 = vpop.xlane.xlu1 %1002 }
 0x941   : > { %2387 = vrcp.f32 %v1003_v62 }
 0x946   : > { %v2384_v54 = vpop.eup %2383 }
 0x947   : > { %v1005_v56 = vmul.f32 %v2384_v54, %v3029_v29  ;;  %v2361_v29 = vld [vmem:[%s3229_s11 + $0x18] sm:$0xff]  }
 0x948   : > { %2208 = vmatpush3.bf16.msra.mxu0 %v2361_v29 }
 0x949   : > { %2209 = vmatprep.subr.bf16.mxu0 %v2665_v8 }
 0x94a   : > { %v2386_v55 = vpop.eup %2385 }
 0x94b   : > { %v1007_v57 = vmul.f32 %v2386_v55, %v3038_v34  ;;  %v2362_v34 = vld [vmem:[%s3229_s11 + $0x10] sm:$0xff]  }
 0x94c   : > { %2210 = vmatpush3.bf16.msra.mxu0 %v2362_v34 }
 0x94d   : > { %v2097_v58 = vpack.c.bf16 %v1007_v57, %v1005_v56  ;;  %2211 = vmatprep.subr.bf16.mxu0 %v2665_v8 }
 0x94e   : > { %v2388_v3 = vpop.eup %2387 }
 0x94f   : > { %2098 = vst [vmem:[%s3099_s27] sm:$0xff] %v2097_v58   ;;  %v1011_v7 = vmul.f32 %v2388_v3, %v3052_v46  ;;  %v2076_v46 = vld [vmem:[%s3228_s10] ss:$0 sm:$0xff] }
 0x950   : > { %2212 = vmatpush3.bf16.msra.mxu0 %v2363_v15 }
 0x951   : > { %2213 = vmatprep.subr.bf16.mxu0 %v2665_v8 }
 0x9c5   : > { %v1673_v61 = vpop.xlane.xlu0 %1672 }
 0x9c6   : > { %v1674_v63 = vmul.f32 0.03125, %v1673_v61 }
 0x9c8   : > { %v1675_v1 = vadd.f32 1e-05, %v1674_v63 }
 0x9c9   : > { %v1001_v2 = vpop.xlane.xlu0 %1000 }
 0x9ca   : > { %2389 = vrsqrt.f32 %v1675_v1 }
 0x9cb   : > { %2391 = vrcp.f32 %v1001_v2 }
 0x9d7   : > { %v2390_v4 = vpop.eup %2389 }
 0x9d8   : > { %v2392_v6 = vpop.eup %2391  ;;  %v1677_v30 = vmul.f32 %v2390_v4, %v1669_v50 }
 0x9d9   : > { %v1009_v9 = vmul.f32 %v2392_v6, %v3045_v43  ;;  %v2364_v43 = vld [vmem:[%s3229_s11] sm:$0xff]  }
 0x9da   : > { %v1684_v11 = vmul.f32 %v2074_v5, %v1677_v30  ;;  %2214 = vmatpush3.bf16.msra.mxu0 %v2364_v43 }
 0x9db   : > { %v2102_v12 = vpack.c.bf16 %v1011_v7, %v1009_v9 }
 0x9dc   : > { %v1691_v13 = vadd.f32 %v2075_v10, %v1684_v11 }
 0x9dd   : > { %2104 = vst [vmem:[%s3099_s27 + $0x8] sm:$0xff] %v2102_v12   ;;  %s2557_s27 = scalar_lea.vmem %s2556_s20, 512 }
 0x9de   : > { %v1692_v14 = vpack.c.bf16 %v1691_v13, %v1691_v13  ;;  %p2559_p13 = scmp.lt.s32.totalorder %s2557_s27, %s2551_s6 }
 0x9e0   : > { %2204 = vmatmul.mubr.msk.bf16.vlgmr.msra.gmra.mxu1 %vm575_vm0, %v1692_v14  ;;  %p2560_p12 = por %p2559_p13, %p2558_p7 }
 0x9e2   : > { %p2561_p3 = pnand %p2560_p12, %p2554_p1 }
 0xaa0   : > { %v1753_v16 = vpop.f32.mrf.mxu1 }
 0xaa1   : > { %v1754_v17 = vadd.f32 %v2076_v46, %v1753_v16 }
 0xaa2   : > { %v2205_v18 = vpop.f32.mrf.mxu1 }
 0xaa3   : > { %v1759_v19 = vmax.f32 %v1754_v17, 0.0 }
 0xaa4   : > { %v1756_v20 = vpop.f32.mrf.mxu1 }
 0xaa5   : > { %v1760_v21 = vpack.c.bf16 %v1759_v19, %v1759_v19 }
 0xaa6   : > { %v2206_v22 = vpop.f32.mrf.mxu1 }
 0xaa7   : > { %2216 = vmatmul.mubr.msk.bf16.vlgmr.msra.gmra.mxu0 %vm1800_vm8, %v1760_v21 }
 0xaa8   : > { %2564 = shalt.err (!%p2561_p3)
}
 0xaa9   : > { %s2565_s25 = scalar_lea.hbm %s3136_s13, 256  ;;  %s2569_s22 = scalar_lea.hbm %s3232_s14, 512 }
 0xaaa   : > { %p2566_p9 = scmp.ne.s32.totalorder %s3136_s13, %s2565_s25  ;;  %p2570_p4 = scmp.lt.s32.totalorder %s3136_s13, %s3232_s14 }
 0xaab   : > { %p2571_p2 = scmp.lt.s32.totalorder %s2569_s22, %s2565_s25 }
 0xaac   : > { %p2567_p6 = pnand %p2566_p9, %p3271_p10 }
 0xaad   : > { %p2572_p5 = por %p2571_p2, %p2570_p4 }
 0xaae   : > { %p2568_p0 = pneg %p2567_p6 }
 0xab0   : > { %p2573_p8 = pnand %p2572_p5, %p2568_p0 }
 0xab2   : > { %2576 = shalt.err (!%p2573_p8)
}
 0xab3   : > { %s2679_s24 = smov 4   ;;  %s2055_s6 = sshll.u32 %s2914_s7, 3  ;;  %v2080_v8 = vld [vmem:[%s3230_s12] ss:$0 sm:$0xff] }
 0xab4   : > { %2242 = dma.vmem_to_hbm [thread:$0]  (%p3271_p10), %s3138_s28, 256, %s3136_s13, %s1852_s3, %s2672_s8, %s2672_s8, %s2679_s24  }
 0xab5   : > { %s2088_s27 = sshll.u32 %s2777_s19, 7  ;;  %s559_s25 = scalar_lea.vmem [#allocation13], %s2055_s6 }
 0xab6   : > { %s1865_s26 = sshll.u32 %s559_s25, 4  ;;  %s3272_s23 = sld [smem:[#allocation30_spill]]  ;;  %s3176_s26 = int_to_ptr.vmem [resolvable:$true] %s1865_s26 }
 0xab7   : > { %s1847_s19 = scalar_lea.sflag [#allocation4], %s2914_s7  ;;  %s2577_s8 = scalar_lea.vmem %s3176_s26, 128 }
 0xab8   : > { %p2578_p11 = scmp.ne.s32.totalorder %s3176_s26, %s2577_s8  ;;  %s2680_s28 = smov [#allocation13]  }
 0xab9   : > { %s2581_s13 = sshll.u32 %s2680_s28, 4  ;;  %s2582_s13 = int_to_ptr.vmem [resolvable:$false] %s2581_s13 }
 0xaba   : > { %p2579_p1 = pnand %p2578_p11, %p3271_p10  ;;  %s2583_s3 = scalar_lea.vmem %s2582_s13, 256 }
 0xabb   : > { %p2584_p13 = scmp.lt.s32.totalorder %s3176_s26, %s2582_s13  ;;  %p2585_p12 = scmp.lt.s32.totalorder %s2583_s3, %s2577_s8 }
 0xabc   : > { %s3174_s2 = scalar_lea.hbm %s3272_s23, %s2088_s27  ;;  %p2580_p7 = pneg %p2579_p1 }
 0xabd   : > { %p2586_p3 = por %p2585_p12, %p2584_p13 }
 0xabf   : > { %p2587_p9 = pnand %p2586_p3, %p2580_p7 }
 0xb67   : > { %v1838_v23 = vpop.f32.mrf.mxu0 }
 0xb68   : > { %v1839_v24 = vadd.f32 %v2080_v8, %v1838_v23 }
 0xb69   : > { %v2217_v25 = vpop.f32.mrf.mxu0 }
 0xb6a   : > { %v1844_v26 = vadd.f32 %v1839_v24, %v3086_v42 }
 0xb6b   : > { %v1841_v27 = vpop.f32.mrf.mxu0 }
 0xb6c   : > { %1845 = vst.msk [vmem:[%s559_s25] sm:$0xff] %vm575_vm0, %v1844_v26 }
 0xb6d   : > { %v2218_v28 = vpop.f32.mrf.mxu0 }
 0xb6e   : > { %2590 = shalt.err (!%p2587_p9)
}
 0xb6f   : > { %s2591_s24 = scalar_lea.hbm %s3174_s2, 128  ;;  %s2595_s15 = scalar_lea.hbm %s3272_s23, 256 }
 0xb70   : > { %p2592_p6 = scmp.ne.s32.totalorder %s3174_s2, %s2591_s24  ;;  %p2596_p2 = scmp.lt.s32.totalorder %s3174_s2, %s3272_s23 }
 0xb71   : > { %p2597_p5 = scmp.lt.s32.totalorder %s2595_s15, %s2591_s24 }
 0xb72   : > { %p2593_p0 = pnand %p2592_p6, %p3271_p10 }
 0xb73   : > { %p2598_p8 = por %p2597_p5, %p2596_p2 }
 0xb74   : > { %p2594_p4 = pneg %p2593_p0 }
 0xb76   : > { %p2599_p11 = pnand %p2598_p8, %p2594_p4 }
 0xb78   : > { %2602 = shalt.err (!%p2599_p11)
}
 0xb79   : > { %2241 = dma.vmem_to_hbm [thread:$0]  (%p3271_p10), %s3176_s26, 128, %s3174_s2, %s1847_s19  }
 0xb7a PF: > { %s1893_s25 = sand.u32 1, %s2645_s29   ;;  %p3273_p1 = scmp.ne.s32.totalorder %s3261_s17, 0 }
 0xb7b   : > { %p3274_p7 = scmp.ge.s32.totalorder %s2657_s16, 2  ;;  %s1894_s18 = scalar_lea.sflag [#allocation4], %s1893_s25 }
 0xb7d   : > { %p2266_p13 = pnand %p3274_p7, %p3273_p1 }
 0xb7f   : > { %p2267_p12 = pneg %p2266_p13 }
 0xb81   : > { %2636 = dma.done.wait (%p2267_p12), %s1894_s18, 128  }
 0xb82   : > { %2638 = vsyncadd (%p2267_p12), %s1894_s18, 4294967168  ;;  %s1903_s22 = scalar_lea.sflag [#allocation15], %s1893_s25 }
 0xb83   : > { %2640 = dma.done.wait (%p2267_p12), %s1903_s22, 256  }
 0xb84   : > { %2642 = vsyncadd (%p2267_p12), %s1903_s22, 4294967040  ;;  %s3275_s16 = sld [smem:[#allocation23_spill]]  ;;  %s3278_s29 = smov %s2649_s30 }
 0xb85   : > { %s3276_s21 = sld [smem:[#allocation22_spill]] }
 0xb86   : > { %s3277_s15 = sld [smem:[#allocation24_spill]] }
 0xb8a   : > { %p34_p10 = scmp.ge.s32.totalorder %s3275_s16, 4  }
 0xb8b   : > { %s3279_s30 = smov %s3276_s21 }
 0xb8c   :  { %36 = sbr.rel (!%p34_p10) target bundleno = 17 (0x11), region = 157 }
 0xb91   :  { %1908 = vsyncpa [#allocation3], 1 }
 0xb92   :  { %1910 = vsyncpa [#allocation3 + $0x1], 1 }
 0xb93   :  { %1911 = vsyncpa [#allocation6], 1 }
 0xb94   :  { %1912 = vsyncpa [#allocation9], 1 }
 0xb95   :  { %1913 = vsyncpa [#allocation12], 1 }
 0xb96   :  { %1914 = vsyncpa [#allocation4], 1 }
 0xb97   :  { %1916 = vsyncpa [#allocation4 + $0x1], 1 }
 0xb98   :  { %1917 = vsyncpa [#allocation15], 1 }
 0xb99   :  { %1919 = vsyncpa [#allocation15 + $0x1], 1 }

</bundles_post_ra>
